<compile_context>
chip_gen: v6e
topology: v6e:2x2x1
jax: 0.10.0
libtpu: 0.0.40
codegen_flags: <defaults>
</compile_context>

<pallas_src>
import functools

import jax
import jax.numpy as jnp
from jax.experimental import pallas as pl
from jax.experimental.pallas import tpu as pltpu


# --------------------------------------------------------------------------
# Kernel A: fused conv1x1 + bilinear upsample + pad (one batch image per step)
#   x_ref : (C1, H1*W1) bf16      w_ref : (C2, C1) bf16     b_ref : (C2, 1) f32
#   u_ref : (H1*W1, Le) bf16      o_ref : (C2, Le) bf16
# --------------------------------------------------------------------------
def _conv1x1_upsample_kernel(x_ref, w_ref, b_ref, u_ref, o_ref):
    z = jnp.dot(w_ref[...], x_ref[...], preferred_element_type=jnp.float32)
    z = z + b_ref[...]                                   # bias before upsample
    up = jnp.dot(z.astype(jnp.bfloat16), u_ref[...],
                 preferred_element_type=jnp.float32)
    o_ref[...] = up.astype(o_ref.dtype)


def conv1x1_upsample_pallas(x1_flat, w1x1, b1, u_t):
    N, C1, HW1 = x1_flat.shape
    C2 = w1x1.shape[0]
    Le = u_t.shape[1]
    return pl.pallas_call(
        _conv1x1_upsample_kernel,
        out_shape=jax.ShapeDtypeStruct((N, C2, Le), jnp.bfloat16),
        grid=(N,),
        in_specs=[
            pl.BlockSpec((None, C1, HW1), lambda n: (n, 0, 0)),
            pl.BlockSpec((C2, C1), lambda n: (0, 0)),
            pl.BlockSpec((C2, 1), lambda n: (0, 0)),
            pl.BlockSpec((HW1, Le), lambda n: (0, 0)),
        ],
        out_specs=pl.BlockSpec((None, C2, Le), lambda n: (n, 0, 0)),
        compiler_params=pltpu.CompilerParams(dimension_semantics=("parallel",)),
    )(x1_flat, w1x1, b1, u_t)


# --------------------------------------------------------------------------
# Kernel B: fused ConvBlock (two conv3x3 + BN + LeakyReLU), concat split.
#   up_ref / x2_ref : (C2, Le) bf16   -- padded-grid layout with lane margin m
#   wa_*_ref : (9, Cout, C2) bf16     wb_ref : (9, Cout, Cout) bf16
#   bn_ref  : (Cout, 4) f32  [scale_a, shift_a, scale_b, shift_b]
#   mask_ref: (1, Lp) f32  (1.0 on the valid H2xW2 interior of the padded grid)
#   o_ref   : (Cout, Lp) f32          y1e_ref : (Cout, Le) bf16 VMEM scratch
# --------------------------------------------------------------------------
def _convblock_kernel(up_ref, x2_ref, wa_up_ref, wa_x2_ref, wb_ref,
                      bn_ref, mask_ref, o_ref, y1e_ref, *, Wp, Lp, m):
    Cout = o_ref.shape[0]
    mask = mask_ref[...]                                 # (1, Lp)

    # ---- conv3x3 #1 : concat([up, x2]) split into two accumulated convs ----
    acc = jnp.zeros((Cout, Lp), jnp.float32)
    for k in range(9):                                   # static unrolled taps
        dy, dx = k // 3, k % 3
        off = m + (dy - 1) * Wp + (dx - 1)               # static lane offset
        acc = acc + jnp.dot(wa_up_ref[k], up_ref[:, off:off + Lp],
                            preferred_element_type=jnp.float32)
        acc = acc + jnp.dot(wa_x2_ref[k], x2_ref[:, off:off + Lp],
                            preferred_element_type=jnp.float32)
    y1 = acc * bn_ref[:, 0:1] + bn_ref[:, 1:2]           # folded bias + BN
    y1 = jnp.where(y1 >= 0, y1, 0.01 * y1)               # LeakyReLU(0.01)
    y1 = y1 * mask                                       # zero SAME-pad border
    # TODO(synk): Dropout between the convs is identity (eval mode).

    # stage y1 in the margin-extended layout for the second conv's taps
    y1e_ref[...] = jnp.zeros(y1e_ref.shape, y1e_ref.dtype)
    y1e_ref[:, m:m + Lp] = y1.astype(y1e_ref.dtype)

    # ---- conv3x3 #2 + BN + LeakyReLU ----
    acc2 = jnp.zeros((Cout, Lp), jnp.float32)
    for k in range(9):
        dy, dx = k // 3, k % 3
        off = m + (dy - 1) * Wp + (dx - 1)
        acc2 = acc2 + jnp.dot(wb_ref[k], y1e_ref[:, off:off + Lp],
                              preferred_element_type=jnp.float32)
    y2 = acc2 * bn_ref[:, 2:3] + bn_ref[:, 3:4]
    y2 = jnp.where(y2 >= 0, y2, 0.01 * y2)
    o_ref[...] = y2


def convblock_pallas(up_ext, x2_ext, wa_up, wa_x2, wb, bn_pack, mask, Wp, Lp, m):
    N, C2, Le = up_ext.shape
    Cout = wb.shape[1]
    kern = functools.partial(_convblock_kernel, Wp=Wp, Lp=Lp, m=m)
    return pl.pallas_call(
        kern,
        out_shape=jax.ShapeDtypeStruct((N, Cout, Lp), jnp.float32),
        grid=(N,),
        in_specs=[
            pl.BlockSpec((None, C2, Le), lambda n: (n, 0, 0)),
            pl.BlockSpec((None, C2, Le), lambda n: (n, 0, 0)),
            pl.BlockSpec((9, Cout, C2), lambda n: (0, 0, 0)),
            pl.BlockSpec((9, Cout, C2), lambda n: (0, 0, 0)),
            pl.BlockSpec((9, Cout, Cout), lambda n: (0, 0, 0)),
            pl.BlockSpec((Cout, 4), lambda n: (0, 0)),
            pl.BlockSpec((1, Lp), lambda n: (0, 0)),
        ],
        out_specs=pl.BlockSpec((None, Cout, Lp), lambda n: (n, 0, 0)),
        scratch_shapes=[pltpu.VMEM((Cout, Le), jnp.bfloat16)],
        compiler_params=pltpu.CompilerParams(dimension_semantics=("parallel",)),
    )(up_ext, x2_ext, wa_up, wa_x2, wb, bn_pack, mask)


# --------------------------------------------------------------------------
# Glue helpers (plain JAX, constant-folded under jit)
# --------------------------------------------------------------------------
def fold_bn(conv_bias, gamma, beta, running_mean, running_var, eps=1e-5):
    scale = gamma / jnp.sqrt(running_var + eps)
    shift = (conv_bias - running_mean) * scale + beta
    return scale.astype(jnp.float32), shift.astype(jnp.float32)


def interp_matrix(n_in, n_out):
    # 1-D linear interpolation matrix, align_corners=True
    if n_in == 1:
        return jnp.ones((n_out, 1), jnp.float32)
    src = jnp.arange(n_out, dtype=jnp.float32) * (n_in - 1) / (n_out - 1)
    lo = jnp.clip(jnp.floor(src).astype(jnp.int32), 0, n_in - 2)
    frac = src - lo.astype(jnp.float32)
    rows = jnp.arange(n_out)
    M = jnp.zeros((n_out, n_in), jnp.float32)
    M = M.at[rows, lo].add(1.0 - frac)
    M = M.at[rows, lo + 1].add(frac)
    return M


# --------------------------------------------------------------------------
# UpBlock forward (NCHW in / NCHW out; no transposes needed)
# --------------------------------------------------------------------------
def upblock_forward(x1_nchw, x2_nchw, p):
    N, C1, H1, W1 = x1_nchw.shape
    _, C2, H2, W2 = x2_nchw.shape
    Cout = p["w_a"].shape[0]
    HW1 = H1 * W1
    Hp, Wp = H2 + 2, W2 + 2        # conv3x3 SAME-padded grid
    Lp = Hp * Wp                   # flattened padded-grid length (lane axis)
    m = Wp + 1                     # lane margin: every 3x3 tap is a static slice
    Le = Lp + 2 * m

    # Combined (bilinear upsample + UpBlock pad + conv SAME pad + margin) matrix.
    UH = interp_matrix(H1, 2 * H1)                        # (2H1, H1)
    UW = interp_matrix(W1, 2 * W1)                        # (2W1, W1)
    dY, dX = H2 - 2 * H1, W2 - 2 * W1
    AH = jnp.zeros((Hp, H1), jnp.float32).at[1 + dY // 2:1 + dY // 2 + 2 * H1].set(UH)
    AW = jnp.zeros((Wp, W1), jnp.float32).at[1 + dX // 2:1 + dX // 2 + 2 * W1].set(UW)
    Ugrid = jnp.einsum("Rh,Cw->RChw", AH, AW).reshape(Lp, HW1)
    Uext = jnp.zeros((Le, HW1), jnp.float32).at[m:m + Lp].set(Ugrid)
    U_T = Uext.T.astype(jnp.bfloat16)                     # (HW1, Le)

    # Kernel A: conv1x1 + upsample + pad, output already in padded/flat layout.
    x1_flat = x1_nchw.reshape(N, C1, HW1).astype(jnp.bfloat16)
    up_ext = conv1x1_upsample_pallas(
        x1_flat, p["w_1x1"].astype(jnp.bfloat16),
        p["b_1x1"].reshape(C2, 1).astype(jnp.float32), U_T)

    # Skip connection in the same padded/flat layout (tiny glue on an input).
    x2p = jnp.pad(x2_nchw, ((0, 0), (0, 0), (1, 1), (1, 1))).reshape(N, C2, Lp)
    x2_ext = jnp.pad(x2p, ((0, 0), (0, 0), (m, m))).astype(jnp.bfloat16)

    # Per-tap weight matrices; channel concat split into two conv halves.
    wa = jnp.transpose(p["w_a"], (2, 3, 0, 1)).reshape(9, Cout, 2 * C2)
    wa_up = wa[:, :, :C2].astype(jnp.bfloat16)
    wa_x2 = wa[:, :, C2:].astype(jnp.bfloat16)
    wb = jnp.transpose(p["w_b"], (2, 3, 0, 1)).reshape(9, Cout, Cout).astype(jnp.bfloat16)

    s_a, t_a = fold_bn(p["b_a"], p["bn_a_g"], p["bn_a_b"], p["bn_a_m"], p["bn_a_v"])
    s_b, t_b = fold_bn(p["b_b"], p["bn_b_g"], p["bn_b_b"], p["bn_b_m"], p["bn_b_v"])
    bn_pack = jnp.stack([s_a, t_a, s_b, t_b], axis=1).astype(jnp.float32)  # (Cout,4)

    pos = jnp.arange(Lp)
    rr, cc = pos // Wp, pos % Wp
    mask = ((rr >= 1) & (rr <= H2) & (cc >= 1) & (cc <= W2)).astype(jnp.float32)
    mask = mask.reshape(1, Lp)

    # Kernel B: fused ConvBlock.
    y_pad = convblock_pallas(up_ext, x2_ext, wa_up, wa_x2, wb, bn_pack, mask,
                             Wp, Lp, m)
    # Drop the SAME-pad border -> NCHW output.
    return y_pad.reshape(N, Cout, Hp, Wp)[:, :, 1:1 + H2, 1:1 + W2]


# --------------------------------------------------------------------------
# Pure-JAX f32 reference (for correctness check)
# --------------------------------------------------------------------------
def upblock_reference(x1, x2, p):
    N, C1, H1, W1 = x1.shape
    y = jnp.einsum("oc,nchw->nohw", p["w_1x1"], x1) + p["b_1x1"][None, :, None, None]
    UH = interp_matrix(H1, 2 * H1)
    UW = interp_matrix(W1, 2 * W1)
    y = jnp.einsum("Hh,nchw->ncHw", UH, y)
    y = jnp.einsum("Ww,nchw->nchW", UW, y)
    dY = x2.shape[2] - y.shape[2]
    dX = x2.shape[3] - y.shape[3]
    y = jnp.pad(y, ((0, 0), (0, 0), (dY // 2, dY - dY // 2), (dX // 2, dX - dX // 2)))
    x = jnp.concatenate([y, x2], axis=1)

    def block(x, w, scale, shift):
        o = jax.lax.conv_general_dilated(
            x, w, (1, 1), "SAME", dimension_numbers=("NCHW", "OIHW", "NCHW"))
        o = o * scale[None, :, None, None] + shift[None, :, None, None]
        return jnp.where(o >= 0, o, 0.01 * o)

    s_a, t_a = fold_bn(p["b_a"], p["bn_a_g"], p["bn_a_b"], p["bn_a_m"], p["bn_a_v"])
    h = block(x, p["w_a"], s_a, t_a)
    s_b, t_b = fold_bn(p["b_b"], p["bn_b_g"], p["bn_b_b"], p["bn_b_m"], p["bn_b_v"])
    return block(h, p["w_b"], s_b, t_b)


# --------------------------------------------------------------------------
# Deterministic synthetic parameter init (PyTorch OIHW layout)
# --------------------------------------------------------------------------
def init_params(key, c1, c2, cout):
    ks = jax.random.split(key, 16)
    s = 0.1
    cin_a = 2 * c2
    return {
        "w_1x1": s * jax.random.normal(ks[0], (c2, c1), jnp.float32),
        "b_1x1": s * jax.random.normal(ks[1], (c2,), jnp.float32),
        "w_a": s * jax.random.normal(ks[2], (cout, cin_a, 3, 3), jnp.float32),
        "b_a": s * jax.random.normal(ks[3], (cout,), jnp.float32),
        "bn_a_g": 1.0 + 0.1 * jax.random.normal(ks[4], (cout,), jnp.float32),
        "bn_a_b": 0.1 * jax.random.normal(ks[5], (cout,), jnp.float32),
        "bn_a_m": 0.1 * jax.random.normal(ks[6], (cout,), jnp.float32),
        "bn_a_v": 0.9 + 0.1 * jnp.abs(jax.random.normal(ks[7], (cout,), jnp.float32)),
        "w_b": s * jax.random.normal(ks[8], (cout, cout, 3, 3), jnp.float32),
        "b_b": s * jax.random.normal(ks[9], (cout,), jnp.float32),
        "bn_b_g": 1.0 + 0.1 * jax.random.normal(ks[10], (cout,), jnp.float32),
        "bn_b_b": 0.1 * jax.random.normal(ks[11], (cout,), jnp.float32),
        "bn_b_m": 0.1 * jax.random.normal(ks[12], (cout,), jnp.float32),
        "bn_b_v": 0.9 + 0.1 * jnp.abs(jax.random.normal(ks[13], (cout,), jnp.float32)),
    }


if __name__ == "__main__":
    key = jax.random.PRNGKey(0)
    k1, k2, kp = jax.random.split(key, 3)

    # UpBlock(in_channels1=8, in_channels2=4, out_channels=4, dropout_p=0.1)
    N, C1, C2, COUT = 2, 8, 4, 4
    H1, W1 = 8, 8        # x1 (deeper, coarser feature map)
    H2, W2 = 16, 16      # x2 (skip connection, 2x spatial)

    x1 = jax.random.normal(k1, (N, C1, H1, W1), jnp.float32)   # NCHW
    x2 = jax.random.normal(k2, (N, C2, H2, W2), jnp.float32)   # NCHW
    params = init_params(kp, C1, C2, COUT)

    fwd = jax.jit(upblock_forward)
    out = fwd(x1, x2, params)
    out = jax.block_until_ready(out)

    ref = upblock_reference(x1, x2, params)
    assert out.shape == (N, COUT, H2, W2), out.shape
    # bf16 matmul operands with f32 accumulation -> slightly relaxed tolerance.
    assert jnp.allclose(out, ref, rtol=2e-2, atol=2e-2), float(
        jnp.max(jnp.abs(out - ref)))

    print("KERNEL_OK")
</pallas_src>

<mosaic_0001>
module attributes {stable_mosaic.version = 11 : i64} {
  func.func private @main(%arg0: i32) attributes {dimension_semantics = [#tpu.dimension_semantics<core_parallel>], iteration_bounds = array<i64: 2>, tpu.core_type = #tpu.core_type<sc_scalar_subcore>, window_params = []} {
    return
  }
}

module attributes {stable_mosaic.version = 11 : i64} {
  func.func private @main(%arg0: i32) attributes {dimension_semantics = [#tpu.dimension_semantics<core_parallel>], iteration_bounds = array<i64: 2>, tpu.core_type = #tpu.core_type<sc_scalar_subcore>, window_params = []} {
    return
  }
}

module attributes {stable_mosaic.version = 11 : i64} {
  func.func @_conv1x1_upsample_kernel(%arg0: i32, %arg1: memref<1x8x64xbf16, #tpu.memory_space<vmem>>, %arg2: memref<4x8xbf16, #tpu.memory_space<vmem>>, %arg3: memref<4x1xf32, #tpu.memory_space<vmem>>, %arg4: memref<64x362xbf16, #tpu.memory_space<vmem>>, %arg5: memref<1x4x362xbf16, #tpu.memory_space<vmem>>) attributes {dimension_semantics = [#tpu.dimension_semantics<parallel>], iteration_bounds = array<i64: 2>, scalar_prefetch = 0 : i64, scratch_operands = 0 : i64, tpu.core_type = #tpu.core_type<tc>, window_params = [{transform_indices = @transform_0, window_bounds = array<i64: 1, 8, 64>}, {pipeline_mode = #tpu.pipeline_mode<synchronous>, transform_indices = @transform_1, window_bounds = array<i64: 4, 8>}, {pipeline_mode = #tpu.pipeline_mode<synchronous>, transform_indices = @transform_2, window_bounds = array<i64: 4, 1>}, {pipeline_mode = #tpu.pipeline_mode<synchronous>, transform_indices = @transform_3, window_bounds = array<i64: 64, 362>}, {transform_indices = @transform_4, window_bounds = array<i64: 1, 4, 362>}]} {
    %c0 = arith.constant 0 : index
    %c0_0 = arith.constant 0 : index
    %0 = vector.load %arg2[%c0, %c0_0] : memref<4x8xbf16, #tpu.memory_space<vmem>>, vector<4x8xbf16>
    %c0_1 = arith.constant 0 : index
    %c0_2 = arith.constant 0 : index
    %c0_3 = arith.constant 0 : index
    %1 = vector.load %arg1[%c0_1, %c0_2, %c0_3] : memref<1x8x64xbf16, #tpu.memory_space<vmem>>, vector<1x8x64xbf16>
    %2 = vector.shape_cast %1 : vector<1x8x64xbf16> to vector<8x64xbf16>
    %cst = arith.constant dense<0.000000e+00> : vector<4x64xf32>
    %3 = tpu.matmul %0, %2, %cst {dimension_numbers = #tpu.dot_dimension_numbers<[1], [0], [0], [1], [0, 0, 1, 1], [], []>} : vector<4x8xbf16>, vector<8x64xbf16>, vector<4x64xf32> -> vector<4x64xf32>
    %c0_4 = arith.constant 0 : index
    %c0_5 = arith.constant 0 : index
    %4 = vector.load %arg3[%c0_4, %c0_5] : memref<4x1xf32, #tpu.memory_space<vmem>>, vector<4x1xf32>
    %5 = vector.broadcast %4 : vector<4x1xf32> to vector<4x64xf32>
    %6 = arith.addf %3, %5 : vector<4x64xf32>
    %7 = arith.truncf %6 : vector<4x64xf32> to vector<4x64xbf16>
    %c0_6 = arith.constant 0 : index
    %c0_7 = arith.constant 0 : index
    %8 = vector.load %arg4[%c0_6, %c0_7] : memref<64x362xbf16, #tpu.memory_space<vmem>>, vector<64x362xbf16>
    %cst_8 = arith.constant dense<0.000000e+00> : vector<4x362xf32>
    %9 = tpu.matmul %7, %8, %cst_8 {dimension_numbers = #tpu.dot_dimension_numbers<[1], [0], [0], [1], [0, 0, 1, 1], [], []>} : vector<4x64xbf16>, vector<64x362xbf16>, vector<4x362xf32> -> vector<4x362xf32>
    %10 = arith.truncf %9 : vector<4x362xf32> to vector<4x362xbf16>
    %c0_9 = arith.constant 0 : index
    %c0_10 = arith.constant 0 : index
    %c0_11 = arith.constant 0 : index
    %11 = vector.load %arg5[%c0_9, %c0_10, %c0_11] : memref<1x4x362xbf16, #tpu.memory_space<vmem>>, vector<1x4x362xbf16>
    %12 = vector.shape_cast %11 : vector<1x4x362xbf16> to vector<4x362xbf16>
    %13 = vector.shape_cast %10 : vector<4x362xbf16> to vector<1x4x362xbf16>
    tpu.vector_store %arg5[%c0_9, %c0_10, %c0_11], %13 {strides = array<i32>} : memref<1x4x362xbf16, #tpu.memory_space<vmem>>, vector<1x4x362xbf16>,
    return
  }
  func.func @transform_0(%arg0: i32) -> (i32, i32, i32) {
    %c0_i32 = arith.constant 0 : i32
    %c0_i32_0 = arith.constant 0 : i32
    %c0_i32_1 = arith.constant 0 : i32
    return %arg0, %c0_i32, %c0_i32_0 : i32, i32, i32
  }
  func.func @transform_1(%arg0: i32) -> (i32, i32) {
    %c0_i32 = arith.constant 0 : i32
    %c0_i32_0 = arith.constant 0 : i32
    %c0_i32_1 = arith.constant 0 : i32
    return %c0_i32, %c0_i32_0 : i32, i32
  }
  func.func @transform_2(%arg0: i32) -> (i32, i32) {
    %c0_i32 = arith.constant 0 : i32
    %c0_i32_0 = arith.constant 0 : i32
    %c0_i32_1 = arith.constant 0 : i32
    return %c0_i32, %c0_i32_0 : i32, i32
  }
  func.func @transform_3(%arg0: i32) -> (i32, i32) {
    %c0_i32 = arith.constant 0 : i32
    %c0_i32_0 = arith.constant 0 : i32
    %c0_i32_1 = arith.constant 0 : i32
    return %c0_i32, %c0_i32_0 : i32, i32
  }
  func.func @transform_4(%arg0: i32) -> (i32, i32, i32) {
    %c0_i32 = arith.constant 0 : i32
    %c0_i32_0 = arith.constant 0 : i32
    %c0_i32_1 = arith.constant 0 : i32
    return %arg0, %c0_i32, %c0_i32_0 : i32, i32, i32
  }
}

module attributes {stable_mosaic.version = 11 : i64} {
  func.func @_convblock_kernel(%arg0: i32, %arg1: memref<1x4x362xbf16, #tpu.memory_space<vmem>>, %arg2: memref<1x4x362xbf16, #tpu.memory_space<vmem>>, %arg3: memref<9x4x4xbf16, #tpu.memory_space<vmem>>, %arg4: memref<9x4x4xbf16, #tpu.memory_space<vmem>>, %arg5: memref<9x4x4xbf16, #tpu.memory_space<vmem>>, %arg6: memref<4x4xf32, #tpu.memory_space<vmem>>, %arg7: memref<1x324xf32, #tpu.memory_space<vmem>>, %arg8: memref<1x4x324xf32, #tpu.memory_space<vmem>>, %arg9: memref<4x362xbf16, #tpu.memory_space<vmem>>) attributes {dimension_semantics = [#tpu.dimension_semantics<parallel>], iteration_bounds = array<i64: 2>, scalar_prefetch = 0 : i64, scratch_operands = 1 : i64, tpu.core_type = #tpu.core_type<tc>, window_params = [{transform_indices = @transform_0, window_bounds = array<i64: 1, 4, 362>}, {transform_indices = @transform_1, window_bounds = array<i64: 1, 4, 362>}, {pipeline_mode = #tpu.pipeline_mode<synchronous>, transform_indices = @transform_2, window_bounds = array<i64: 9, 4, 4>}, {pipeline_mode = #tpu.pipeline_mode<synchronous>, transform_indices = @transform_3, window_bounds = array<i64: 9, 4, 4>}, {pipeline_mode = #tpu.pipeline_mode<synchronous>, transform_indices = @transform_4, window_bounds = array<i64: 9, 4, 4>}, {pipeline_mode = #tpu.pipeline_mode<synchronous>, transform_indices = @transform_5, window_bounds = array<i64: 4, 4>}, {pipeline_mode = #tpu.pipeline_mode<synchronous>, transform_indices = @transform_6, window_bounds = array<i64: 1, 324>}, {transform_indices = @transform_7, window_bounds = array<i64: 1, 4, 324>}]} {
    %c0 = arith.constant 0 : index
    %c0_0 = arith.constant 0 : index
    %0 = vector.load %arg7[%c0, %c0_0] : memref<1x324xf32, #tpu.memory_space<vmem>>, vector<1x324xf32>
    %cst = arith.constant 0.000000e+00 : f32
    %1 = vector.broadcast %cst : f32 to vector<4x324xf32>
    %c0_1 = arith.constant 0 : index
    %c0_2 = arith.constant 0 : index
    %c0_3 = arith.constant 0 : index
    %2 = vector.load %arg3[%c0_1, %c0_2, %c0_3] : memref<9x4x4xbf16, #tpu.memory_space<vmem>>, vector<1x4x4xbf16>
    %3 = vector.shape_cast %2 : vector<1x4x4xbf16> to vector<4x4xbf16>
    %c0_4 = arith.constant 0 : index
    %c0_5 = arith.constant 0 : index
    %c0_6 = arith.constant 0 : index
    %4 = vector.load %arg1[%c0_4, %c0_5, %c0_6] : memref<1x4x362xbf16, #tpu.memory_space<vmem>>, vector<1x4x324xbf16>
    %5 = vector.shape_cast %4 : vector<1x4x324xbf16> to vector<4x324xbf16>
    %cst_7 = arith.constant dense<0.000000e+00> : vector<4x324xf32>
    %6 = tpu.matmul %3, %5, %cst_7 {dimension_numbers = #tpu.dot_dimension_numbers<[1], [0], [0], [1], [0, 0, 1, 1], [], []>} : vector<4x4xbf16>, vector<4x324xbf16>, vector<4x324xf32> -> vector<4x324xf32>
    %7 = arith.addf %1, %6 : vector<4x324xf32>
    %c0_8 = arith.constant 0 : index
    %c0_9 = arith.constant 0 : index
    %c0_10 = arith.constant 0 : index
    %8 = vector.load %arg4[%c0_8, %c0_9, %c0_10] : memref<9x4x4xbf16, #tpu.memory_space<vmem>>, vector<1x4x4xbf16>
    %9 = vector.shape_cast %8 : vector<1x4x4xbf16> to vector<4x4xbf16>
    %c0_11 = arith.constant 0 : index
    %c0_12 = arith.constant 0 : index
    %c0_13 = arith.constant 0 : index
    %10 = vector.load %arg2[%c0_11, %c0_12, %c0_13] : memref<1x4x362xbf16, #tpu.memory_space<vmem>>, vector<1x4x324xbf16>
    %11 = vector.shape_cast %10 : vector<1x4x324xbf16> to vector<4x324xbf16>
    %cst_14 = arith.constant dense<0.000000e+00> : vector<4x324xf32>
    %12 = tpu.matmul %9, %11, %cst_14 {dimension_numbers = #tpu.dot_dimension_numbers<[1], [0], [0], [1], [0, 0, 1, 1], [], []>} : vector<4x4xbf16>, vector<4x324xbf16>, vector<4x324xf32> -> vector<4x324xf32>
    %13 = arith.addf %7, %12 : vector<4x324xf32>
    %c1 = arith.constant 1 : index
    %c0_15 = arith.constant 0 : index
    %c0_16 = arith.constant 0 : index
    %14 = vector.load %arg3[%c1, %c0_15, %c0_16] : memref<9x4x4xbf16, #tpu.memory_space<vmem>>, vector<1x4x4xbf16>
    %15 = vector.shape_cast %14 : vector<1x4x4xbf16> to vector<4x4xbf16>
    %c0_17 = arith.constant 0 : index
    %c0_18 = arith.constant 0 : index
    %c1_19 = arith.constant 1 : index
    %16 = vector.load %arg1[%c0_17, %c0_18, %c1_19] : memref<1x4x362xbf16, #tpu.memory_space<vmem>>, vector<1x4x324xbf16>
    %17 = vector.shape_cast %16 : vector<1x4x324xbf16> to vector<4x324xbf16>
    %cst_20 = arith.constant dense<0.000000e+00> : vector<4x324xf32>
    %18 = tpu.matmul %15, %17, %cst_20 {dimension_numbers = #tpu.dot_dimension_numbers<[1], [0], [0], [1], [0, 0, 1, 1], [], []>} : vector<4x4xbf16>, vector<4x324xbf16>, vector<4x324xf32> -> vector<4x324xf32>
    %19 = arith.addf %13, %18 : vector<4x324xf32>
    %c1_21 = arith.constant 1 : index
    %c0_22 = arith.constant 0 : index
    %c0_23 = arith.constant 0 : index
    %20 = vector.load %arg4[%c1_21, %c0_22, %c0_23] : memref<9x4x4xbf16, #tpu.memory_space<vmem>>, vector<1x4x4xbf16>
    %21 = vector.shape_cast %20 : vector<1x4x4xbf16> to vector<4x4xbf16>
    %c0_24 = arith.constant 0 : index
    %c0_25 = arith.constant 0 : index
    %c1_26 = arith.constant 1 : index
    %22 = vector.load %arg2[%c0_24, %c0_25, %c1_26] : memref<1x4x362xbf16, #tpu.memory_space<vmem>>, vector<1x4x324xbf16>
    %23 = vector.shape_cast %22 : vector<1x4x324xbf16> to vector<4x324xbf16>
    %cst_27 = arith.constant dense<0.000000e+00> : vector<4x324xf32>
    %24 = tpu.matmul %21, %23, %cst_27 {dimension_numbers = #tpu.dot_dimension_numbers<[1], [0], [0], [1], [0, 0, 1, 1], [], []>} : vector<4x4xbf16>, vector<4x324xbf16>, vector<4x324xf32> -> vector<4x324xf32>
    %25 = arith.addf %19, %24 : vector<4x324xf32>
    %c2 = arith.constant 2 : index
    %c0_28 = arith.constant 0 : index
    %c0_29 = arith.constant 0 : index
    %26 = vector.load %arg3[%c2, %c0_28, %c0_29] : memref<9x4x4xbf16, #tpu.memory_space<vmem>>, vector<1x4x4xbf16>
    %27 = vector.shape_cast %26 : vector<1x4x4xbf16> to vector<4x4xbf16>
    %c0_30 = arith.constant 0 : index
    %c0_31 = arith.constant 0 : index
    %c2_32 = arith.constant 2 : index
    %28 = vector.load %arg1[%c0_30, %c0_31, %c2_32] : memref<1x4x362xbf16, #tpu.memory_space<vmem>>, vector<1x4x324xbf16>
    %29 = vector.shape_cast %28 : vector<1x4x324xbf16> to vector<4x324xbf16>
    %cst_33 = arith.constant dense<0.000000e+00> : vector<4x324xf32>
    %30 = tpu.matmul %27, %29, %cst_33 {dimension_numbers = #tpu.dot_dimension_numbers<[1], [0], [0], [1], [0, 0, 1, 1], [], []>} : vector<4x4xbf16>, vector<4x324xbf16>, vector<4x324xf32> -> vector<4x324xf32>
    %31 = arith.addf %25, %30 : vector<4x324xf32>
    %c2_34 = arith.constant 2 : index
    %c0_35 = arith.constant 0 : index
    %c0_36 = arith.constant 0 : index
    %32 = vector.load %arg4[%c2_34, %c0_35, %c0_36] : memref<9x4x4xbf16, #tpu.memory_space<vmem>>, vector<1x4x4xbf16>
    %33 = vector.shape_cast %32 : vector<1x4x4xbf16> to vector<4x4xbf16>
    %c0_37 = arith.constant 0 : index
    %c0_38 = arith.constant 0 : index
    %c2_39 = arith.constant 2 : index
    %34 = vector.load %arg2[%c0_37, %c0_38, %c2_39] : memref<1x4x362xbf16, #tpu.memory_space<vmem>>, vector<1x4x324xbf16>
    %35 = vector.shape_cast %34 : vector<1x4x324xbf16> to vector<4x324xbf16>
    %cst_40 = arith.constant dense<0.000000e+00> : vector<4x324xf32>
    %36 = tpu.matmul %33, %35, %cst_40 {dimension_numbers = #tpu.dot_dimension_numbers<[1], [0], [0], [1], [0, 0, 1, 1], [], []>} : vector<4x4xbf16>, vector<4x324xbf16>, vector<4x324xf32> -> vector<4x324xf32>
    %37 = arith.addf %31, %36 : vector<4x324xf32>
    %c3 = arith.constant 3 : index
    %c0_41 = arith.constant 0 : index
    %c0_42 = arith.constant 0 : index
    %38 = vector.load %arg3[%c3, %c0_41, %c0_42] : memref<9x4x4xbf16, #tpu.memory_space<vmem>>, vector<1x4x4xbf16>
    %39 = vector.shape_cast %38 : vector<1x4x4xbf16> to vector<4x4xbf16>
    %c0_43 = arith.constant 0 : index
    %c0_44 = arith.constant 0 : index
    %c18 = arith.constant 18 : index
    %40 = vector.load %arg1[%c0_43, %c0_44, %c18] : memref<1x4x362xbf16, #tpu.memory_space<vmem>>, vector<1x4x324xbf16>
    %41 = vector.shape_cast %40 : vector<1x4x324xbf16> to vector<4x324xbf16>
    %cst_45 = arith.constant dense<0.000000e+00> : vector<4x324xf32>
    %42 = tpu.matmul %39, %41, %cst_45 {dimension_numbers = #tpu.dot_dimension_numbers<[1], [0], [0], [1], [0, 0, 1, 1], [], []>} : vector<4x4xbf16>, vector<4x324xbf16>, vector<4x324xf32> -> vector<4x324xf32>
    %43 = arith.addf %37, %42 : vector<4x324xf32>
    %c3_46 = arith.constant 3 : index
    %c0_47 = arith.constant 0 : index
    %c0_48 = arith.constant 0 : index
    %44 = vector.load %arg4[%c3_46, %c0_47, %c0_48] : memref<9x4x4xbf16, #tpu.memory_space<vmem>>, vector<1x4x4xbf16>
    %45 = vector.shape_cast %44 : vector<1x4x4xbf16> to vector<4x4xbf16>
    %c0_49 = arith.constant 0 : index
    %c0_50 = arith.constant 0 : index
    %c18_51 = arith.constant 18 : index
    %46 = vector.load %arg2[%c0_49, %c0_50, %c18_51] : memref<1x4x362xbf16, #tpu.memory_space<vmem>>, vector<1x4x324xbf16>
    %47 = vector.shape_cast %46 : vector<1x4x324xbf16> to vector<4x324xbf16>
    %cst_52 = arith.constant dense<0.000000e+00> : vector<4x324xf32>
    %48 = tpu.matmul %45, %47, %cst_52 {dimension_numbers = #tpu.dot_dimension_numbers<[1], [0], [0], [1], [0, 0, 1, 1], [], []>} : vector<4x4xbf16>, vector<4x324xbf16>, vector<4x324xf32> -> vector<4x324xf32>
    %49 = arith.addf %43, %48 : vector<4x324xf32>
    %c4 = arith.constant 4 : index
    %c0_53 = arith.constant 0 : index
    %c0_54 = arith.constant 0 : index
    %50 = vector.load %arg3[%c4, %c0_53, %c0_54] : memref<9x4x4xbf16, #tpu.memory_space<vmem>>, vector<1x4x4xbf16>
    %51 = vector.shape_cast %50 : vector<1x4x4xbf16> to vector<4x4xbf16>
    %c0_55 = arith.constant 0 : index
    %c0_56 = arith.constant 0 : index
    %c19 = arith.constant 19 : index
    %52 = vector.load %arg1[%c0_55, %c0_56, %c19] : memref<1x4x362xbf16, #tpu.memory_space<vmem>>, vector<1x4x324xbf16>
    %53 = vector.shape_cast %52 : vector<1x4x324xbf16> to vector<4x324xbf16>
    %cst_57 = arith.constant dense<0.000000e+00> : vector<4x324xf32>
    %54 = tpu.matmul %51, %53, %cst_57 {dimension_numbers = #tpu.dot_dimension_numbers<[1], [0], [0], [1], [0, 0, 1, 1], [], []>} : vector<4x4xbf16>, vector<4x324xbf16>, vector<4x324xf32> -> vector<4x324xf32>
    %55 = arith.addf %49, %54 : vector<4x324xf32>
    %c4_58 = arith.constant 4 : index
    %c0_59 = arith.constant 0 : index
    %c0_60 = arith.constant 0 : index
    %56 = vector.load %arg4[%c4_58, %c0_59, %c0_60] : memref<9x4x4xbf16, #tpu.memory_space<vmem>>, vector<1x4x4xbf16>
    %57 = vector.shape_cast %56 : vector<1x4x4xbf16> to vector<4x4xbf16>
    %c0_61 = arith.constant 0 : index
    %c0_62 = arith.constant 0 : index
    %c19_63 = arith.constant 19 : index
    %58 = vector.load %arg2[%c0_61, %c0_62, %c19_63] : memref<1x4x362xbf16, #tpu.memory_space<vmem>>, vector<1x4x324xbf16>
    %59 = vector.shape_cast %58 : vector<1x4x324xbf16> to vector<4x324xbf16>
    %cst_64 = arith.constant dense<0.000000e+00> : vector<4x324xf32>
    %60 = tpu.matmul %57, %59, %cst_64 {dimension_numbers = #tpu.dot_dimension_numbers<[1], [0], [0], [1], [0, 0, 1, 1], [], []>} : vector<4x4xbf16>, vector<4x324xbf16>, vector<4x324xf32> -> vector<4x324xf32>
    %61 = arith.addf %55, %60 : vector<4x324xf32>
    %c5 = arith.constant 5 : index
    %c0_65 = arith.constant 0 : index
    %c0_66 = arith.constant 0 : index
    %62 = vector.load %arg3[%c5, %c0_65, %c0_66] : memref<9x4x4xbf16, #tpu.memory_space<vmem>>, vector<1x4x4xbf16>
    %63 = vector.shape_cast %62 : vector<1x4x4xbf16> to vector<4x4xbf16>
    %c0_67 = arith.constant 0 : index
    %c0_68 = arith.constant 0 : index
    %c20 = arith.constant 20 : index
    %64 = vector.load %arg1[%c0_67, %c0_68, %c20] : memref<1x4x362xbf16, #tpu.memory_space<vmem>>, vector<1x4x324xbf16>
    %65 = vector.shape_cast %64 : vector<1x4x324xbf16> to vector<4x324xbf16>
    %cst_69 = arith.constant dense<0.000000e+00> : vector<4x324xf32>
    %66 = tpu.matmul %63, %65, %cst_69 {dimension_numbers = #tpu.dot_dimension_numbers<[1], [0], [0], [1], [0, 0, 1, 1], [], []>} : vector<4x4xbf16>, vector<4x324xbf16>, vector<4x324xf32> -> vector<4x324xf32>
    %67 = arith.addf %61, %66 : vector<4x324xf32>
    %c5_70 = arith.constant 5 : index
    %c0_71 = arith.constant 0 : index
    %c0_72 = arith.constant 0 : index
    %68 = vector.load %arg4[%c5_70, %c0_71, %c0_72] : memref<9x4x4xbf16, #tpu.memory_space<vmem>>, vector<1x4x4xbf16>
    %69 = vector.shape_cast %68 : vector<1x4x4xbf16> to vector<4x4xbf16>
    %c0_73 = arith.constant 0 : index
    %c0_74 = arith.constant 0 : index
    %c20_75 = arith.constant 20 : index
    %70 = vector.load %arg2[%c0_73, %c0_74, %c20_75] : memref<1x4x362xbf16, #tpu.memory_space<vmem>>, vector<1x4x324xbf16>
    %71 = vector.shape_cast %70 : vector<1x4x324xbf16> to vector<4x324xbf16>
    %cst_76 = arith.constant dense<0.000000e+00> : vector<4x324xf32>
    %72 = tpu.matmul %69, %71, %cst_76 {dimension_numbers = #tpu.dot_dimension_numbers<[1], [0], [0], [1], [0, 0, 1, 1], [], []>} : vector<4x4xbf16>, vector<4x324xbf16>, vector<4x324xf32> -> vector<4x324xf32>
    %73 = arith.addf %67, %72 : vector<4x324xf32>
    %c6 = arith.constant 6 : index
    %c0_77 = arith.constant 0 : index
    %c0_78 = arith.constant 0 : index
    %74 = vector.load %arg3[%c6, %c0_77, %c0_78] : memref<9x4x4xbf16, #tpu.memory_space<vmem>>, vector<1x4x4xbf16>
    %75 = vector.shape_cast %74 : vector<1x4x4xbf16> to vector<4x4xbf16>
    %c0_79 = arith.constant 0 : index
    %c0_80 = arith.constant 0 : index
    %c36 = arith.constant 36 : index
    %76 = vector.load %arg1[%c0_79, %c0_80, %c36] : memref<1x4x362xbf16, #tpu.memory_space<vmem>>, vector<1x4x324xbf16>
    %77 = vector.shape_cast %76 : vector<1x4x324xbf16> to vector<4x324xbf16>
    %cst_81 = arith.constant dense<0.000000e+00> : vector<4x324xf32>
    %78 = tpu.matmul %75, %77, %cst_81 {dimension_numbers = #tpu.dot_dimension_numbers<[1], [0], [0], [1], [0, 0, 1, 1], [], []>} : vector<4x4xbf16>, vector<4x324xbf16>, vector<4x324xf32> -> vector<4x324xf32>
    %79 = arith.addf %73, %78 : vector<4x324xf32>
    %c6_82 = arith.constant 6 : index
    %c0_83 = arith.constant 0 : index
    %c0_84 = arith.constant 0 : index
    %80 = vector.load %arg4[%c6_82, %c0_83, %c0_84] : memref<9x4x4xbf16, #tpu.memory_space<vmem>>, vector<1x4x4xbf16>
    %81 = vector.shape_cast %80 : vector<1x4x4xbf16> to vector<4x4xbf16>
    %c0_85 = arith.constant 0 : index
    %c0_86 = arith.constant 0 : index
    %c36_87 = arith.constant 36 : index
    %82 = vector.load %arg2[%c0_85, %c0_86, %c36_87] : memref<1x4x362xbf16, #tpu.memory_space<vmem>>, vector<1x4x324xbf16>
    %83 = vector.shape_cast %82 : vector<1x4x324xbf16> to vector<4x324xbf16>
    %cst_88 = arith.constant dense<0.000000e+00> : vector<4x324xf32>
    %84 = tpu.matmul %81, %83, %cst_88 {dimension_numbers = #tpu.dot_dimension_numbers<[1], [0], [0], [1], [0, 0, 1, 1], [], []>} : vector<4x4xbf16>, vector<4x324xbf16>, vector<4x324xf32> -> vector<4x324xf32>
    %85 = arith.addf %79, %84 : vector<4x324xf32>
    %c7 = arith.constant 7 : index
    %c0_89 = arith.constant 0 : index
    %c0_90 = arith.constant 0 : index
    %86 = vector.load %arg3[%c7, %c0_89, %c0_90] : memref<9x4x4xbf16, #tpu.memory_space<vmem>>, vector<1x4x4xbf16>
    %87 = vector.shape_cast %86 : vector<1x4x4xbf16> to vector<4x4xbf16>
    %c0_91 = arith.constant 0 : index
    %c0_92 = arith.constant 0 : index
    %c37 = arith.constant 37 : index
    %88 = vector.load %arg1[%c0_91, %c0_92, %c37] : memref<1x4x362xbf16, #tpu.memory_space<vmem>>, vector<1x4x324xbf16>
    %89 = vector.shape_cast %88 : vector<1x4x324xbf16> to vector<4x324xbf16>
    %cst_93 = arith.constant dense<0.000000e+00> : vector<4x324xf32>
    %90 = tpu.matmul %87, %89, %cst_93 {dimension_numbers = #tpu.dot_dimension_numbers<[1], [0], [0], [1], [0, 0, 1, 1], [], []>} : vector<4x4xbf16>, vector<4x324xbf16>, vector<4x324xf32> -> vector<4x324xf32>
    %91 = arith.addf %85, %90 : vector<4x324xf32>
    %c7_94 = arith.constant 7 : index
    %c0_95 = arith.constant 0 : index
    %c0_96 = arith.constant 0 : index
    %92 = vector.load %arg4[%c7_94, %c0_95, %c0_96] : memref<9x4x4xbf16, #tpu.memory_space<vmem>>, vector<1x4x4xbf16>
    %93 = vector.shape_cast %92 : vector<1x4x4xbf16> to vector<4x4xbf16>
    %c0_97 = arith.constant 0 : index
    %c0_98 = arith.constant 0 : index
    %c37_99 = arith.constant 37 : index
    %94 = vector.load %arg2[%c0_97, %c0_98, %c37_99] : memref<1x4x362xbf16, #tpu.memory_space<vmem>>, vector<1x4x324xbf16>
    %95 = vector.shape_cast %94 : vector<1x4x324xbf16> to vector<4x324xbf16>
    %cst_100 = arith.constant dense<0.000000e+00> : vector<4x324xf32>
    %96 = tpu.matmul %93, %95, %cst_100 {dimension_numbers = #tpu.dot_dimension_numbers<[1], [0], [0], [1], [0, 0, 1, 1], [], []>} : vector<4x4xbf16>, vector<4x324xbf16>, vector<4x324xf32> -> vector<4x324xf32>
    %97 = arith.addf %91, %96 : vector<4x324xf32>
    %c8 = arith.constant 8 : index
    %c0_101 = arith.constant 0 : index
    %c0_102 = arith.constant 0 : index
    %98 = vector.load %arg3[%c8, %c0_101, %c0_102] : memref<9x4x4xbf16, #tpu.memory_space<vmem>>, vector<1x4x4xbf16>
    %99 = vector.shape_cast %98 : vector<1x4x4xbf16> to vector<4x4xbf16>
    %c0_103 = arith.constant 0 : index
    %c0_104 = arith.constant 0 : index
    %c38 = arith.constant 38 : index
    %100 = vector.load %arg1[%c0_103, %c0_104, %c38] : memref<1x4x362xbf16, #tpu.memory_space<vmem>>, vector<1x4x324xbf16>
    %101 = vector.shape_cast %100 : vector<1x4x324xbf16> to vector<4x324xbf16>
    %cst_105 = arith.constant dense<0.000000e+00> : vector<4x324xf32>
    %102 = tpu.matmul %99, %101, %cst_105 {dimension_numbers = #tpu.dot_dimension_numbers<[1], [0], [0], [1], [0, 0, 1, 1], [], []>} : vector<4x4xbf16>, vector<4x324xbf16>, vector<4x324xf32> -> vector<4x324xf32>
    %103 = arith.addf %97, %102 : vector<4x324xf32>
    %c8_106 = arith.constant 8 : index
    %c0_107 = arith.constant 0 : index
    %c0_108 = arith.constant 0 : index
    %104 = vector.load %arg4[%c8_106, %c0_107, %c0_108] : memref<9x4x4xbf16, #tpu.memory_space<vmem>>, vector<1x4x4xbf16>
    %105 = vector.shape_cast %104 : vector<1x4x4xbf16> to vector<4x4xbf16>
    %c0_109 = arith.constant 0 : index
    %c0_110 = arith.constant 0 : index
    %c38_111 = arith.constant 38 : index
    %106 = vector.load %arg2[%c0_109, %c0_110, %c38_111] : memref<1x4x362xbf16, #tpu.memory_space<vmem>>, vector<1x4x324xbf16>
    %107 = vector.shape_cast %106 : vector<1x4x324xbf16> to vector<4x324xbf16>
    %cst_112 = arith.constant dense<0.000000e+00> : vector<4x324xf32>
    %108 = tpu.matmul %105, %107, %cst_112 {dimension_numbers = #tpu.dot_dimension_numbers<[1], [0], [0], [1], [0, 0, 1, 1], [], []>} : vector<4x4xbf16>, vector<4x324xbf16>, vector<4x324xf32> -> vector<4x324xf32>
    %109 = arith.addf %103, %108 : vector<4x324xf32>
    %c0_113 = arith.constant 0 : index
    %c0_114 = arith.constant 0 : index
    %110 = vector.load %arg6[%c0_113, %c0_114] : memref<4x4xf32, #tpu.memory_space<vmem>>, vector<4x1xf32>
    %111 = vector.broadcast %110 : vector<4x1xf32> to vector<4x324xf32>
    %112 = arith.mulf %109, %111 : vector<4x324xf32>
    %c0_115 = arith.constant 0 : index
    %c1_116 = arith.constant 1 : index
    %113 = vector.load %arg6[%c0_115, %c1_116] : memref<4x4xf32, #tpu.memory_space<vmem>>, vector<4x1xf32>
    %114 = vector.broadcast %113 : vector<4x1xf32> to vector<4x324xf32>
    %115 = arith.addf %112, %114 : vector<4x324xf32>
    %cst_117 = arith.constant 0.000000e+00 : f32
    %116 = vector.broadcast %cst_117 : f32 to vector<4x324xf32>
    %117 = arith.cmpf oge, %115, %116 : vector<4x324xf32>
    %cst_118 = arith.constant 0.00999999977 : f32
    %118 = vector.broadcast %cst_118 : f32 to vector<4x324xf32>
    %119 = arith.mulf %118, %115 : vector<4x324xf32>
    %120 = arith.select %117, %115, %119 : vector<4x324xi1>, vector<4x324xf32>
    %121 = vector.broadcast %0 : vector<1x324xf32> to vector<4x324xf32>
    %122 = arith.mulf %120, %121 : vector<4x324xf32>
    %cst_119 = arith.constant 0.000000e+00 : bf16
    %123 = vector.broadcast %cst_119 : bf16 to vector<4x362xbf16>
    %c0_120 = arith.constant 0 : index
    %c0_121 = arith.constant 0 : index
    %124 = vector.load %arg9[%c0_120, %c0_121] : memref<4x362xbf16, #tpu.memory_space<vmem>>, vector<4x362xbf16>
    tpu.vector_store %arg9[%c0_120, %c0_121], %123 {strides = array<i32>} : memref<4x362xbf16, #tpu.memory_space<vmem>>, vector<4x362xbf16>,
    %125 = arith.truncf %122 : vector<4x324xf32> to vector<4x324xbf16>
    %c0_122 = arith.constant 0 : index
    %c19_123 = arith.constant 19 : index
    %126 = vector.load %arg9[%c0_122, %c19_123] : memref<4x362xbf16, #tpu.memory_space<vmem>>, vector<4x324xbf16>
    tpu.vector_store %arg9[%c0_122, %c19_123], %125 {strides = array<i32>} : memref<4x362xbf16, #tpu.memory_space<vmem>>, vector<4x324xbf16>,
    %cst_124 = arith.constant 0.000000e+00 : f32
    %127 = vector.broadcast %cst_124 : f32 to vector<4x324xf32>
    %c0_125 = arith.constant 0 : index
    %c0_126 = arith.constant 0 : index
    %c0_127 = arith.constant 0 : index
    %128 = vector.load %arg5[%c0_125, %c0_126, %c0_127] : memref<9x4x4xbf16, #tpu.memory_space<vmem>>, vector<1x4x4xbf16>
    %129 = vector.shape_cast %128 : vector<1x4x4xbf16> to vector<4x4xbf16>
    %c0_128 = arith.constant 0 : index
    %c0_129 = arith.constant 0 : index
    %130 = vector.load %arg9[%c0_128, %c0_129] : memref<4x362xbf16, #tpu.memory_space<vmem>>, vector<4x324xbf16>
    %cst_130 = arith.constant dense<0.000000e+00> : vector<4x324xf32>
    %131 = tpu.matmul %129, %130, %cst_130 {dimension_numbers = #tpu.dot_dimension_numbers<[1], [0], [0], [1], [0, 0, 1, 1], [], []>} : vector<4x4xbf16>, vector<4x324xbf16>, vector<4x324xf32> -> vector<4x324xf32>
    %132 = arith.addf %127, %131 : vector<4x324xf32>
    %c1_131 = arith.constant 1 : index
    %c0_132 = arith.constant 0 : index
    %c0_133 = arith.constant 0 : index
    %133 = vector.load %arg5[%c1_131, %c0_132, %c0_133] : memref<9x4x4xbf16, #tpu.memory_space<vmem>>, vector<1x4x4xbf16>
    %134 = vector.shape_cast %133 : vector<1x4x4xbf16> to vector<4x4xbf16>
    %c0_134 = arith.constant 0 : index
    %c1_135 = arith.constant 1 : index
    %135 = vector.load %arg9[%c0_134, %c1_135] : memref<4x362xbf16, #tpu.memory_space<vmem>>, vector<4x324xbf16>
    %cst_136 = arith.constant dense<0.000000e+00> : vector<4x324xf32>
    %136 = tpu.matmul %134, %135, %cst_136 {dimension_numbers = #tpu.dot_dimension_numbers<[1], [0], [0], [1], [0, 0, 1, 1], [], []>} : vector<4x4xbf16>, vector<4x324xbf16>, vector<4x324xf32> -> vector<4x324xf32>
    %137 = arith.addf %132, %136 : vector<4x324xf32>
    %c2_137 = arith.constant 2 : index
    %c0_138 = arith.constant 0 : index
    %c0_139 = arith.constant 0 : index
    %138 = vector.load %arg5[%c2_137, %c0_138, %c0_139] : memref<9x4x4xbf16, #tpu.memory_space<vmem>>, vector<1x4x4xbf16>
    %139 = vector.shape_cast %138 : vector<1x4x4xbf16> to vector<4x4xbf16>
    %c0_140 = arith.constant 0 : index
    %c2_141 = arith.constant 2 : index
    %140 = vector.load %arg9[%c0_140, %c2_141] : memref<4x362xbf16, #tpu.memory_space<vmem>>, vector<4x324xbf16>
    %cst_142 = arith.constant dense<0.000000e+00> : vector<4x324xf32>
    %141 = tpu.matmul %139, %140, %cst_142 {dimension_numbers = #tpu.dot_dimension_numbers<[1], [0], [0], [1], [0, 0, 1, 1], [], []>} : vector<4x4xbf16>, vector<4x324xbf16>, vector<4x324xf32> -> vector<4x324xf32>
    %142 = arith.addf %137, %141 : vector<4x324xf32>
    %c3_143 = arith.constant 3 : index
    %c0_144 = arith.constant 0 : index
    %c0_145 = arith.constant 0 : index
    %143 = vector.load %arg5[%c3_143, %c0_144, %c0_145] : memref<9x4x4xbf16, #tpu.memory_space<vmem>>, vector<1x4x4xbf16>
    %144 = vector.shape_cast %143 : vector<1x4x4xbf16> to vector<4x4xbf16>
    %c0_146 = arith.constant 0 : index
    %c18_147 = arith.constant 18 : index
    %145 = vector.load %arg9[%c0_146, %c18_147] : memref<4x362xbf16, #tpu.memory_space<vmem>>, vector<4x324xbf16>
    %cst_148 = arith.constant dense<0.000000e+00> : vector<4x324xf32>
    %146 = tpu.matmul %144, %145, %cst_148 {dimension_numbers = #tpu.dot_dimension_numbers<[1], [0], [0], [1], [0, 0, 1, 1], [], []>} : vector<4x4xbf16>, vector<4x324xbf16>, vector<4x324xf32> -> vector<4x324xf32>
    %147 = arith.addf %142, %146 : vector<4x324xf32>
    %c4_149 = arith.constant 4 : index
    %c0_150 = arith.constant 0 : index
    %c0_151 = arith.constant 0 : index
    %148 = vector.load %arg5[%c4_149, %c0_150, %c0_151] : memref<9x4x4xbf16, #tpu.memory_space<vmem>>, vector<1x4x4xbf16>
    %149 = vector.shape_cast %148 : vector<1x4x4xbf16> to vector<4x4xbf16>
    %c0_152 = arith.constant 0 : index
    %c19_153 = arith.constant 19 : index
    %150 = vector.load %arg9[%c0_152, %c19_153] : memref<4x362xbf16, #tpu.memory_space<vmem>>, vector<4x324xbf16>
    %cst_154 = arith.constant dense<0.000000e+00> : vector<4x324xf32>
    %151 = tpu.matmul %149, %150, %cst_154 {dimension_numbers = #tpu.dot_dimension_numbers<[1], [0], [0], [1], [0, 0, 1, 1], [], []>} : vector<4x4xbf16>, vector<4x324xbf16>, vector<4x324xf32> -> vector<4x324xf32>
    %152 = arith.addf %147, %151 : vector<4x324xf32>
    %c5_155 = arith.constant 5 : index
    %c0_156 = arith.constant 0 : index
    %c0_157 = arith.constant 0 : index
    %153 = vector.load %arg5[%c5_155, %c0_156, %c0_157] : memref<9x4x4xbf16, #tpu.memory_space<vmem>>, vector<1x4x4xbf16>
    %154 = vector.shape_cast %153 : vector<1x4x4xbf16> to vector<4x4xbf16>
    %c0_158 = arith.constant 0 : index
    %c20_159 = arith.constant 20 : index
    %155 = vector.load %arg9[%c0_158, %c20_159] : memref<4x362xbf16, #tpu.memory_space<vmem>>, vector<4x324xbf16>
    %cst_160 = arith.constant dense<0.000000e+00> : vector<4x324xf32>
    %156 = tpu.matmul %154, %155, %cst_160 {dimension_numbers = #tpu.dot_dimension_numbers<[1], [0], [0], [1], [0, 0, 1, 1], [], []>} : vector<4x4xbf16>, vector<4x324xbf16>, vector<4x324xf32> -> vector<4x324xf32>
    %157 = arith.addf %152, %156 : vector<4x324xf32>
    %c6_161 = arith.constant 6 : index
    %c0_162 = arith.constant 0 : index
    %c0_163 = arith.constant 0 : index
    %158 = vector.load %arg5[%c6_161, %c0_162, %c0_163] : memref<9x4x4xbf16, #tpu.memory_space<vmem>>, vector<1x4x4xbf16>
    %159 = vector.shape_cast %158 : vector<1x4x4xbf16> to vector<4x4xbf16>
    %c0_164 = arith.constant 0 : index
    %c36_165 = arith.constant 36 : index
    %160 = vector.load %arg9[%c0_164, %c36_165] : memref<4x362xbf16, #tpu.memory_space<vmem>>, vector<4x324xbf16>
    %cst_166 = arith.constant dense<0.000000e+00> : vector<4x324xf32>
    %161 = tpu.matmul %159, %160, %cst_166 {dimension_numbers = #tpu.dot_dimension_numbers<[1], [0], [0], [1], [0, 0, 1, 1], [], []>} : vector<4x4xbf16>, vector<4x324xbf16>, vector<4x324xf32> -> vector<4x324xf32>
    %162 = arith.addf %157, %161 : vector<4x324xf32>
    %c7_167 = arith.constant 7 : index
    %c0_168 = arith.constant 0 : index
    %c0_169 = arith.constant 0 : index
    %163 = vector.load %arg5[%c7_167, %c0_168, %c0_169] : memref<9x4x4xbf16, #tpu.memory_space<vmem>>, vector<1x4x4xbf16>
    %164 = vector.shape_cast %163 : vector<1x4x4xbf16> to vector<4x4xbf16>
    %c0_170 = arith.constant 0 : index
    %c37_171 = arith.constant 37 : index
    %165 = vector.load %arg9[%c0_170, %c37_171] : memref<4x362xbf16, #tpu.memory_space<vmem>>, vector<4x324xbf16>
    %cst_172 = arith.constant dense<0.000000e+00> : vector<4x324xf32>
    %166 = tpu.matmul %164, %165, %cst_172 {dimension_numbers = #tpu.dot_dimension_numbers<[1], [0], [0], [1], [0, 0, 1, 1], [], []>} : vector<4x4xbf16>, vector<4x324xbf16>, vector<4x324xf32> -> vector<4x324xf32>
    %167 = arith.addf %162, %166 : vector<4x324xf32>
    %c8_173 = arith.constant 8 : index
    %c0_174 = arith.constant 0 : index
    %c0_175 = arith.constant 0 : index
    %168 = vector.load %arg5[%c8_173, %c0_174, %c0_175] : memref<9x4x4xbf16, #tpu.memory_space<vmem>>, vector<1x4x4xbf16>
    %169 = vector.shape_cast %168 : vector<1x4x4xbf16> to vector<4x4xbf16>
    %c0_176 = arith.constant 0 : index
    %c38_177 = arith.constant 38 : index
    %170 = vector.load %arg9[%c0_176, %c38_177] : memref<4x362xbf16, #tpu.memory_space<vmem>>, vector<4x324xbf16>
    %cst_178 = arith.constant dense<0.000000e+00> : vector<4x324xf32>
    %171 = tpu.matmul %169, %170, %cst_178 {dimension_numbers = #tpu.dot_dimension_numbers<[1], [0], [0], [1], [0, 0, 1, 1], [], []>} : vector<4x4xbf16>, vector<4x324xbf16>, vector<4x324xf32> -> vector<4x324xf32>
    %172 = arith.addf %167, %171 : vector<4x324xf32>
    %c0_179 = arith.constant 0 : index
    %c2_180 = arith.constant 2 : index
    %173 = vector.load %arg6[%c0_179, %c2_180] : memref<4x4xf32, #tpu.memory_space<vmem>>, vector<4x1xf32>
    %174 = vector.broadcast %173 : vector<4x1xf32> to vector<4x324xf32>
    %175 = arith.mulf %172, %174 : vector<4x324xf32>
    %c0_181 = arith.constant 0 : index
    %c3_182 = arith.constant 3 : index
    %176 = vector.load %arg6[%c0_181, %c3_182] : memref<4x4xf32, #tpu.memory_space<vmem>>, vector<4x1xf32>
    %177 = vector.broadcast %176 : vector<4x1xf32> to vector<4x324xf32>
    %178 = arith.addf %175, %177 : vector<4x324xf32>
    %cst_183 = arith.constant 0.000000e+00 : f32
    %179 = vector.broadcast %cst_183 : f32 to vector<4x324xf32>
    %180 = arith.cmpf oge, %178, %179 : vector<4x324xf32>
    %cst_184 = arith.constant 0.00999999977 : f32
    %181 = vector.broadcast %cst_184 : f32 to vector<4x324xf32>
    %182 = arith.mulf %181, %178 : vector<4x324xf32>
    %183 = arith.select %180, %178, %182 : vector<4x324xi1>, vector<4x324xf32>
    %c0_185 = arith.constant 0 : index
    %c0_186 = arith.constant 0 : index
    %c0_187 = arith.constant 0 : index
    %184 = vector.load %arg8[%c0_185, %c0_186, %c0_187] : memref<1x4x324xf32, #tpu.memory_space<vmem>>, vector<1x4x324xf32>
    %185 = vector.shape_cast %184 : vector<1x4x324xf32> to vector<4x324xf32>
    %186 = vector.shape_cast %183 : vector<4x324xf32> to vector<1x4x324xf32>
    tpu.vector_store %arg8[%c0_185, %c0_186, %c0_187], %186 {strides = array<i32>} : memref<1x4x324xf32, #tpu.memory_space<vmem>>, vector<1x4x324xf32>,
    return
  }
  func.func @transform_0(%arg0: i32) -> (i32, i32, i32) {
    %c0_i32 = arith.constant 0 : i32
    %c0_i32_0 = arith.constant 0 : i32
    %c0_i32_1 = arith.constant 0 : i32
    return %arg0, %c0_i32, %c0_i32_0 : i32, i32, i32
  }
  func.func @transform_1(%arg0: i32) -> (i32, i32, i32) {
    %c0_i32 = arith.constant 0 : i32
    %c0_i32_0 = arith.constant 0 : i32
    %c0_i32_1 = arith.constant 0 : i32
    return %arg0, %c0_i32, %c0_i32_0 : i32, i32, i32
  }
  func.func @transform_2(%arg0: i32) -> (i32, i32, i32) {
    %c0_i32 = arith.constant 0 : i32
    %c0_i32_0 = arith.constant 0 : i32
    %c0_i32_1 = arith.constant 0 : i32
    %c0_i32_2 = arith.constant 0 : i32
    return %c0_i32, %c0_i32_0, %c0_i32_1 : i32, i32, i32
  }
  func.func @transform_3(%arg0: i32) -> (i32, i32, i32) {
    %c0_i32 = arith.constant 0 : i32
    %c0_i32_0 = arith.constant 0 : i32
    %c0_i32_1 = arith.constant 0 : i32
    %c0_i32_2 = arith.constant 0 : i32
    return %c0_i32, %c0_i32_0, %c0_i32_1 : i32, i32, i32
  }
  func.func @transform_4(%arg0: i32) -> (i32, i32, i32) {
    %c0_i32 = arith.constant 0 : i32
    %c0_i32_0 = arith.constant 0 : i32
    %c0_i32_1 = arith.constant 0 : i32
    %c0_i32_2 = arith.constant 0 : i32
    return %c0_i32, %c0_i32_0, %c0_i32_1 : i32, i32, i32
  }
  func.func @transform_5(%arg0: i32) -> (i32, i32) {
    %c0_i32 = arith.constant 0 : i32
    %c0_i32_0 = arith.constant 0 : i32
    %c0_i32_1 = arith.constant 0 : i32
    return %c0_i32, %c0_i32_0 : i32, i32
  }
  func.func @transform_6(%arg0: i32) -> (i32, i32) {
    %c0_i32 = arith.constant 0 : i32
    %c0_i32_0 = arith.constant 0 : i32
    %c0_i32_1 = arith.constant 0 : i32
    return %c0_i32, %c0_i32_0 : i32, i32
  }
  func.func @transform_7(%arg0: i32) -> (i32, i32, i32) {
    %c0_i32 = arith.constant 0 : i32
    %c0_i32_0 = arith.constant 0 : i32
    %c0_i32_1 = arith.constant 0 : i32
    return %arg0, %c0_i32, %c0_i32_0 : i32, i32, i32
  }
}

</mosaic_0001>

<bundles_post_ra>
// kernel: upblock_forward.2
= control target key start
LH: loop header
LB: loop body
LE: loop exit
PB: predicated region body
PF: predicated region fallthrough
CT: control target
= control target key end

     0   :  { %s619_s15 = smov 0   ;;  %s684_s0 = inlined_call_operand.vmem [shape: bf16[2,8,64], index: 0, kind: input, shape index: {}]   ;;  %s685_s1 = inlined_call_operand.vmem [shape: bf16[4,8], index: 1, kind: input, shape index: {}]   ;;  %s686_s2 = inlined_call_operand.vmem [shape: f32[4,1], index: 2, kind: input, shape index: {}]   ;;  %s687_s3 = inlined_call_operand.vmem [shape: bf16[64,362], index: 3, kind: input, shape index: {}]   ;;  %s688_s4 = inlined_call_operand.vmem [shape: bf16[2,4,362], index: 4, kind: output, shape index: {}]  }
   0x1 LB: > { %s502_s16 = sadd.s32 4294967295, %s588_s15   ;;  %p506_p0 = scmp.ge.s32.totalorder %s588_s15, 1  ;;  %s588_s15 = sphi %s619_s15, %s14_s15  }
   0x2   : > { %p161_p1 = scmp.lt.s32.totalorder %s588_s15, 3 }
   0x4   : > { %p162_p2 = pnand %p506_p0, %p161_p1 }
   0x5   : > { %p186_p3 = scmp.lt.s32.totalorder (!%p162_p2), %s502_s16, 1 }
   0x6   : > { %165 = sbr.rel (%p162_p2) target bundleno = 418 (0x1a2), region = 36 }
   0xb   : > { %v590_v0 = vmov 0.0   ;;  %vm591_vm0 = vmmov 0   ;;  %v198_v1 = vld [vmem:[%s686_s2] sm:$0xf]  ;;  %s690_s16 = smov (!%p186_p3, %s502_s16), 1  ;;  %v592_v2 = vmov 0   ;;  %v428_v27 = vlaneseq }
   0xc   : > { %534 = vmatprep.subr.bf16.mxu0 %v590_v0  ;;  %536 = vmatprep.mubr.msk.bf16.mxu0 %vm591_vm0, %v590_v0  ;;  %v566_v3 = vld [vmem:[%s687_s3 + $0x4c] ss:$12 sps:$4 sm:$0xff]   ;;  %v568_v4 = vld [vmem:[%s687_s3 + $0x48] ss:$12 sps:$4 sm:$0xff]   ;;  %s507_s23 = sshll.u32 %s690_s16, 2  ;;  %vm208_vm1 = vcmask 1043456  }
   0xd   : > { %565 = vset.pattern.permute.xlu0 %v592_v2  ;;  %369 = vmatprep.mubr.bf16.mxu1 %v592_v2  ;;  %v570_v5 = vld [vmem:[%s687_s3 + $0x34] ss:$12 sps:$4 sm:$0xff]   ;;  %s189_s28 = scalar_lea.vmem %s684_s0, %s507_s23  ;;  %v572_v6 = vld [vmem:[%s687_s3 + $0x30] ss:$12 sps:$4 sm:$0xff]   ;;  %vm204_vm2 = vcmask 64512   ;;  %vm333_vm3 = vcmask 523264  }
   0xe   : > { %201 = vperm.xlu0 %565, %v198_v1   ;;  %345 = vmatprep.subr.bf16.mxu1 %v566_v3  ;;  %v197_v7 = vld [vmem:[%s189_s28] sm:$0xf]  ;;  %v569_v10 = vld [vmem:[%s687_s3 + $0x50] ss:$12 sps:$4 sm:$0xff]   ;;  %v576_v12 = vld [vmem:[%s687_s3 + $0x18] ss:$12 sps:$4 sm:$0xff]  }
   0xf   : > { %346 = vmatpush1.bf16.msra.mxu1 %v568_v4  ;;  %v196_v8 = vld [vmem:[%s685_s1] sm:$0x3]  ;;  %v210_v9 = vsel %vm208_vm1, %v197_v7, 0  ;;  %v574_v11 = vld [vmem:[%s687_s3 + $0x1c] ss:$12 sps:$4 sm:$0xff]   ;;  %v429_v29 = vshrl.u32 %v428_v27, 7 }
  0x10   : > { %347 = vmatprep.subr.bf16.mxu1 %v570_v5  ;;  %535 = vmatpush3.bf16.msra.mxu0 %v210_v9  ;;  %v573_v13 = vld [vmem:[%s687_s3 + $0x38] ss:$12 sps:$4 sm:$0xff]   ;;  %v577_v14 = vld [vmem:[%s687_s3 + $0x20] ss:$12 sps:$4 sm:$0xff]   ;;  %v581_v17 = vld [vmem:[%s687_s3 + $0x8] ss:$12 sps:$4 sm:$0xff]  }
  0x11   : > { %540 = vmatprep.subr.bf16.mxu0 %v590_v0  ;;  %v578_v15 = vld [vmem:[%s687_s3 + $0x4] ss:$12 sps:$4 sm:$0xff]   ;;  %v580_v16 = vld [vmem:[%s687_s3] ss:$12 sps:$4 sm:$0xff]   ;;  %v593_v25 = vmov 1983009808  }
  0x12   : > { %v426_v26 = vunpack.c.l.s4 %v593_v25  ;;  %vm441_vm4 = vcmask 1041408   ;;  %vm442_vm5 = vcmask 1043458   ;;  %s552_s25 = smul.u32 6, %s690_s16  ;;  %vm444_vm7 = vcmask 865284  }
  0x13   : > { %348 = vmatpush1.bf16.msra.mxu1 %v572_v6  ;;  %537 = vmatmul.mubr.msk.bf16.vlgmr.msra.gmra.mxu0 %vm204_vm2, %v196_v8  ;;  %vm443_vm6 = vmor %vm442_vm5, %vm441_vm4 }
  0x14   : > { %349 = vmatprep.subr.bf16.mxu1 %v574_v11  ;;  %541 = vmatpush3.bf16.msra.mxu0 %v569_v10  ;;  %v427_v28 = vunpack.c.0.s8 %v426_v26  ;;  %s194_s28 = scalar_lea.vmem %s688_s4, %s552_s25  ;;  %vm445_vm8 = vmor %vm444_vm7, %vm443_vm6 }
  0x15   : > { %548 = vmatprep.mubr.msk.bf16.mxu0 %vm591_vm0, %v590_v0  ;;  %542 = vmatprep.subr.bf16.mxu0 %v590_v0 }
  0x16   : > { %v430_v33 = vsub.s32 %v427_v28, %v429_v29 }
  0x17   : > { %350 = vmatpush1.bf16.msra.mxu1 %v576_v12 }
  0x18   : > { %543 = vmatpush3.bf16.msra.mxu0 %v573_v13  ;;  %351 = vmatprep.subr.bf16.mxu1 %v578_v15 }
  0x19   : > { %544 = vmatprep.subr.bf16.mxu0 %v590_v0 }
  0x1b   : > { %352 = vmatpush1.bf16.msra.mxu1 %v580_v16 }
  0x1c   : > { %545 = vmatpush3.bf16.msra.mxu0 %v577_v14 }
  0x1d   : > { %546 = vmatprep.subr.bf16.mxu0 %v590_v0 }
  0x20   : > { %547 = vmatpush3.bf16.msra.mxu0 %v581_v17 }
  0x89   : > { %v202_v18 = vpop.permute.xlu0 %201 }
  0xd3   : > { %v246_v19 = vpop.f32.mrf.mxu0 }
  0xd4   : > { %v247_v20 = vadd.f32 %v246_v19, %v202_v18 }
  0xd5   : > { %v538_v21 = vpop.f32.mrf.mxu0 }
  0xd6   : > { %v252_v22 = vpack.c.bf16 %v247_v20, %v247_v20 }
  0xd7   : > { %v249_v23 = vpop.f32.mrf.mxu0 }
  0xd8   : > { %522 = vmatmul.mubr.msk.bf16.vlgmr.msra.gmra.mxu1 %vm333_vm3, %v252_v22  ;;  %549 = vmatmul.mubr.msk.bf16.vlgmr.msra.gmra.mxu0 %vm333_vm3, %v252_v22 }
  0xd9   : > { %v539_v24 = vpop.f32.mrf.mxu0 }
 0x198   : > { %v371_v30 = vpop.f32.mrf.mxu1  ;;  %v412_v31 = vpop.f32.mrf.mxu0 }
 0x199   : > { %v420_v32 = vpack.c.bf16 %v412_v31, %v412_v31 }
 0x19a   : > { %v373_v34 = vpop.f32.mrf.mxu1  ;;  %v550_v35 = vpop.f32.mrf.mxu0 }
 0x19b   : > { %v524_v36 = vpack.c.bf16 %v373_v34, %v371_v30  ;;  %v438_v39 = vrot.slane %v420_v32, %v430_v33 }
 0x19c   : > { %v375_v37 = vpop.f32.mrf.mxu1  ;;  %v415_v38 = vpop.f32.mrf.mxu0 }
 0x19d   : > { %v431_v40 = vrot.slane %v524_v36, %v430_v33 }
 0x19e   : > { %v376_v41 = vpop.f32.mrf.mxu1  ;;  %v551_v42 = vpop.f32.mrf.mxu0 }
 0x19f   : > { %v439_v43 = vcombine.low %v431_v40, %v438_v39 }
 0x1a1   : > { %446 = vst.msk [vmem:[%s194_s28] sm:$0x3f] %vm445_vm8, %v439_v43 }
 0x1a2 PF: > { %s14_s15 = sadd.s32 1, %s588_s15  }
 0x1a3   : > { %p11_p4 = scmp.ge.s32.totalorder %s14_s15, 4  }
 0x1a5   :  { %13 = sbr.rel (!%p11_p4) target bundleno = 1 (0x1), region = 66 }

// kernel: upblock_forward.3
= control target key start
LH: loop header
LB: loop body
LE: loop exit
PB: predicated region body
PF: predicated region fallthrough
CT: control target
= control target key end

     0   :  { %s4236_s24 = smov 0   ;;  %s4828_s0 = inlined_call_operand.vmem [shape: bf16[2,4,362], index: 0, kind: input, shape index: {}]   ;;  %s4829_s1 = inlined_call_operand.vmem [shape: bf16[2,4,362], index: 1, kind: input, shape index: {}]   ;;  %s4830_s2 = inlined_call_operand.vmem [shape: bf16[9,4,4], index: 2, kind: input, shape index: {}]   ;;  %s4831_s3 = inlined_call_operand.vmem [shape: bf16[9,4,4], index: 3, kind: input, shape index: {}]   ;;  %s4832_s4 = inlined_call_operand.vmem [shape: bf16[9,4,4], index: 4, kind: input, shape index: {}]   ;;  %s4833_s5 = inlined_call_operand.vmem [shape: f32[4,4], index: 5, kind: input, shape index: {}]   ;;  %s4834_s6 = inlined_call_operand.vmem [shape: f32[1,324], index: 6, kind: input, shape index: {}]   ;;  %s4835_s7 = inlined_call_operand.vmem [shape: f32[2,4,324], index: 7, kind: output, shape index: {}]  }
   0x1 LB: > { %s3783_s25 = sadd.s32 4294967295, %s4178_s24   ;;  %p3787_p0 = scmp.ge.s32.totalorder %s4178_s24, 1  ;;  %s4178_s24 = sphi %s4236_s24, %s17_s24  }
   0x2   : > { %p247_p1 = scmp.lt.s32.totalorder %s4178_s24, 3 }
   0x4   : > { %p248_p2 = pnand %p3787_p0, %p247_p1 }
   0x5   : > { %p284_p3 = scmp.lt.s32.totalorder (!%p248_p2), %s3783_s25, 1  ;;  %s4184_s10 = smov (!%p248_p2), 127  }
   0x6   : > { %251 = sbr.rel (%p248_p2) target bundleno = 999 (0x3e7), region = 48  ;;  %s4185_s11 = smov (!%p248_p2), 126  }
   0x7   : > { %s4186_s16 = smov (!%p248_p2), 110   ;;  %s4187_s17 = smov (!%p248_p2), 109  }
   0x8   : > { %s4188_s18 = smov (!%p248_p2), 108   ;;  %s4189_s19 = smov (!%p248_p2), 92  }
   0x9   : > { %s4190_s20 = smov (!%p248_p2), 91   ;;  %s4191_s21 = smov (!%p248_p2), 90  }
   0xa   : > { %s4193_s13 = smov (!%p248_p2), 19  }
   0xb   : > { %v310_v0 = vlaneseq  ;;  %v4180_v1 = vmov 1983009808   ;;  %v4181_v3 = vmov 0   ;;  %s4843_s25 = smov (!%p284_p3, %s3783_s25), 1  ;;  %v4182_v5 = vmov 0.0  }
   0xc   : > { %v308_v2 = vunpack.c.l.s4 %v4180_v1  ;;  %368 = vmatprep.mubr.bf16.mxu0 %v4181_v3  ;;  %4141 = vset.pattern.permute.xlu0 %v4181_v3  ;;  %vm4183_vm0 = vmmov 0   ;;  %s4115_s26 = smul.u32 6, %s4843_s25  ;;  %vm326_vm1 = vcmask 1041408   ;;  %v303_v37 = vld [vmem:[%s4831_s3] sm:$0x3]  ;;  %vm322_vm2 = vcmask 31744  }
   0xd   : > { %v4248_v4 = vshrl.u32 %v310_v0, 7  ;;  %3953 = vmatprep.subr.bf16.mxu1 %v4182_v5  ;;  %3955 = vmatprep.mubr.msk.bf16.mxu1 %vm4183_vm0, %v4182_v5  ;;  %v301_v48 = vld [vmem:[%s4830_s2] sm:$0x3]  ;;  %vm553_vm3 = vcmask 1039360   ;;  %vm802_vm4 = vcmask 1031168   ;;  %vm1051_vm5 = vcmask 900096  }
   0xe   : > { %v309_v6 = vunpack.c.0.s8 %v308_v2  ;;  %s4260_s29 = scalar_lea.vmem %s4828_s0, %s4115_s26  ;;  %s4265_s9 = scalar_lea.vmem %s4829_s1, %s4115_s26  ;;  %vm1300_vm6 = vcmask 891904   ;;  %vm1549_vm7 = vcmask 883712   ;;  %vm1798_vm8 = vcmask 752640  }
   0xf   : > { %v529_v8 = vld [vmem:[%s4260_s29] sm:$0x3f]  ;;  %vm4837_vm9 = vcmask 744448   ;;  %vm4836_vm10 = vcmask 736256   ;;  %vm2563_vm11 = vcmask 1043458   ;;  %vm2565_vm12 = vcmask 865284  }
  0x10   : > { %v4255_v7 = vsub.s32 %v309_v6, %v4248_v4  ;;  %v654_v9 = vld [vmem:[%s4265_s9] sm:$0x3f]  ;;  %v531_v11 = vcombine.high %v529_v8, %v529_v8  ;;  %vm2564_vm13 = vmor %vm2563_vm11, %vm326_vm1 }
  0x11   : > { %v656_v15 = vcombine.high %v654_v9, %v654_v9  ;;  %v778_v17 = vld [vmem:[%s4260_s29] sm:$0x3f]  ;;  %vm2566_vm14 = vmor %vm2565_vm12, %vm2564_vm13 }
  0x12   : > { %v538_v10 = vrot.slane %v529_v8, %v4255_v7  ;;  %v545_v13 = vrot.slane %v531_v11, %v4255_v7  ;;  %v663_v14 = vrot.slane %v654_v9, %v4255_v7  ;;  %v304_v19 = vld [vmem:[%s4265_s9] sm:$0x3f]  ;;  %v787_v20 = vrot.slane %v778_v17, %v4255_v7  ;;  %2567 = vst.msk [vmem:[#allocation2] sm:$0x3f] %vm2566_vm14, %v4181_v3 }
  0x13   : > { %v670_v18 = vrot.slane %v656_v15, %v4255_v7  ;;  %v780_v21 = vcombine.high %v778_v17, %v778_v17  ;;  %v302_v22 = vld [vmem:[%s4260_s29] sm:$0x3f]  ;;  %v313_v24 = vrot.slane %v304_v19, %v4255_v7  ;;  %v306_v25 = vcombine.high %v304_v19, %v304_v19 }
  0x14   : > { %547 = vrot.lane.b32.xlu0 %v538_v10, %s4184_s10  ;;  %v546_v12 = vcombine.high %v538_v10, %v538_v10  ;;  %551 = vrot.lane.b32.xlu1 %v545_v13, %s4184_s10  ;;  %v671_v16 = vcombine.high %v663_v14, %v663_v14  ;;  %v795_v23 = vcombine.high %v787_v20, %v787_v20  ;;  %v903_v26 = vld [vmem:[%s4265_s9] sm:$0x3f]  ;;  %vm2596_vm14 = vcmask 1041560  }
  0x15   : > { %v425_v27 = vrot.slane %v302_v22, %v4255_v7  ;;  %v418_v28 = vcombine.high %v302_v22, %v302_v22  ;;  %v794_v29 = vrot.slane %v780_v21, %v4255_v7  ;;  %v321_v30 = vcombine.high %v313_v24, %v313_v24  ;;  %v1027_v41 = vld [vmem:[%s4260_s29] sm:$0x3f] }
  0x16   : > { %v328_v31 = vsel %vm326_vm1, %v313_v24, 0  ;;  %v320_v32 = vrot.slane %v306_v25, %v4255_v7  ;;  %v912_v34 = vrot.slane %v903_v26, %v4255_v7  ;;  %v905_v35 = vcombine.high %v903_v26, %v903_v26  ;;  %v1152_v47 = vld [vmem:[%s4265_s9] sm:$0x3f] }
  0x17   : > { %v433_v33 = vcombine.high %v425_v27, %v425_v27  ;;  %3791 = vmatprep.subr.msk.bf16.mxu0 %vm326_vm1, %v321_v30  ;;  %v432_v36 = vrot.slane %v418_v28, %v4255_v7  ;;  %v438_v40 = vsel %vm326_vm1, %v425_v27, 0  ;;  %v1036_v44 = vrot.slane %v1027_v41, %v4255_v7  ;;  %v1276_v53 = vld [vmem:[%s4260_s29] sm:$0x3f] }
  0x18   : > { %549 = vrot.lane.b32.xlu0 %v546_v12, %s4184_s10  ;;  %672 = vrot.lane.b32.xlu1 %v663_v14, %s4184_s10  ;;  %v334_v38 = vsel %vm326_vm1, %v320_v32, 0  ;;  %v920_v39 = vcombine.high %v912_v34, %v912_v34  ;;  %v919_v42 = vrot.slane %v905_v35, %v4255_v7  ;;  %v1029_v45 = vcombine.high %v1027_v41, %v1027_v41  ;;  %v1401_v58 = vld [vmem:[%s4265_s9] sm:$0x3f] }
  0x19   : > { %351 = vmatpush1.bf16.msra.mxu0 %v328_v31  ;;  %3954 = vmatpush3.bf16.msra.mxu1 %v334_v38  ;;  %v444_v43 = vsel %vm326_vm1, %v432_v36, 0  ;;  %v1044_v46 = vcombine.high %v1036_v44, %v1036_v44  ;;  %v1161_v50 = vrot.slane %v1152_v47, %v4255_v7  ;;  %v1154_v51 = vcombine.high %v1152_v47, %v1152_v47  ;;  %v1525_v63 = vld [vmem:[%s4260_s29] sm:$0x3f] }
  0x1a   : > { %3794 = vmatprep.subr.msk.bf16.mxu0 %vm326_vm1, %v433_v33  ;;  %3959 = vmatprep.subr.bf16.mxu1 %v4182_v5  ;;  %v1043_v49 = vrot.slane %v1029_v45, %v4255_v7  ;;  %v1285_v55 = vrot.slane %v1276_v53, %v4255_v7  ;;  %v1278_v56 = vcombine.high %v1276_v53, %v1276_v53  ;;  %v1650_v8 = vld [vmem:[%s4265_s9] sm:$0x3f] }
  0x1b   : > { %v1169_v52 = vcombine.high %v1161_v50, %v1161_v50  ;;  %v1168_v54 = vrot.slane %v1154_v51, %v4255_v7  ;;  %v1410_v60 = vrot.slane %v1401_v58, %v4255_v7  ;;  %v1403_v61 = vcombine.high %v1401_v58, %v1401_v58  ;;  %v1774_v13 = vld [vmem:[%s4260_s29] sm:$0x3f] }
  0x1c   : > { %674 = vrot.lane.b32.xlu0 %v671_v16, %s4184_s10  ;;  %676 = vrot.lane.b32.xlu1 %v670_v18, %s4184_s10  ;;  %v1293_v57 = vcombine.high %v1285_v55, %v1285_v55  ;;  %v1292_v59 = vrot.slane %v1278_v56, %v4255_v7  ;;  %v1534_v1 = vrot.slane %v1525_v63, %v4255_v7  ;;  %v1899_v18 = vld [vmem:[%s4265_s9] sm:$0x3f] }
  0x1d   : > { %3792 = vmatmul.mubr.msk.bf16.vlgmr.msra.gmra.mxu0 %vm322_vm2, %v303_v37  ;;  %3956 = vmatmul.mubr.msk.bf16.vlgmr.msra.gmra.mxu1 %vm322_vm2, %v303_v37  ;;  %v1418_v62 = vcombine.high %v1410_v60, %v1410_v60  ;;  %v1417_v0 = vrot.slane %v1403_v61, %v4255_v7  ;;  %v1527_v2 = vcombine.high %v1525_v63, %v1525_v63  ;;  %v2148_v28 = vld [vmem:[%s4265_s9] sm:$0x3f] }
  0x1e   : > { %461 = vmatpush1.bf16.msra.mxu0 %v438_v40  ;;  %478 = vmatprep.mubr.bf16.mxu0 %v4181_v3  ;;  %v1542_v6 = vcombine.high %v1534_v1, %v1534_v1  ;;  %v1659_v10 = vrot.slane %v1650_v8, %v4255_v7  ;;  %v1652_v11 = vcombine.high %v1650_v8, %v1650_v8  ;;  %v2272_v33 = vld [vmem:[%s4260_s29] sm:$0x3f] }
  0x1f   : > { %3960 = vmatpush3.bf16.msra.mxu1 %v444_v43  ;;  %3961 = vmatprep.mubr.msk.bf16.mxu1 %vm4183_vm0, %v4182_v5  ;;  %v1541_v9 = vrot.slane %v1527_v2, %v4255_v7  ;;  %v1783_v15 = vrot.slane %v1774_v13, %v4255_v7  ;;  %v1776_v16 = vcombine.high %v1774_v13, %v1774_v13  ;;  %v2397_v38 = vld [vmem:[%s4265_s9] sm:$0x3f] }
  0x20   : > { %796 = vrot.lane.b32.xlu0 %v787_v20, %s4185_s11  ;;  %798 = vrot.lane.b32.xlu1 %v795_v23, %s4185_s11  ;;  %v1667_v12 = vcombine.high %v1659_v10, %v1659_v10  ;;  %v1666_v14 = vrot.slane %v1652_v11, %v4255_v7  ;;  %v1908_v20 = vrot.slane %v1899_v18, %v4255_v7  ;;  %v2023_v23 = vld [vmem:[%s4260_s29] sm:$0x3f] }
  0x21   : > { %3965 = vmatprep.subr.bf16.mxu1 %v4182_v5  ;;  %v1791_v17 = vcombine.high %v1783_v15, %v1783_v15  ;;  %v1790_v19 = vrot.slane %v1776_v16, %v4255_v7  ;;  %v1901_v21 = vcombine.high %v1899_v18, %v1899_v18  ;;  %v2032_v25 = vrot.slane %v2023_v23, %v4255_v7 }
  0x22   : > { %v1916_v22 = vcombine.high %v1908_v20, %v1908_v20  ;;  %v2025_v26 = vcombine.high %v2023_v23, %v2023_v23  ;;  %v2157_v30 = vrot.slane %v2148_v28, %v4255_v7  ;;  %v2150_v31 = vcombine.high %v2148_v28, %v2148_v28 }
  0x23   : > { %v1915_v24 = vrot.slane %v1901_v21, %v4255_v7  ;;  %v2040_v27 = vcombine.high %v2032_v25, %v2032_v25  ;;  %v2281_v35 = vrot.slane %v2272_v33, %v4255_v7  ;;  %v2274_v36 = vcombine.high %v2272_v33, %v2272_v33 }
  0x24   : > { %800 = vrot.lane.b32.xlu0 %v794_v29, %s4185_s11  ;;  %921 = vrot.lane.b32.xlu1 %v912_v34, %s4185_s11  ;;  %v2039_v29 = vrot.slane %v2025_v26, %v4255_v7  ;;  %v2165_v32 = vcombine.high %v2157_v30, %v2157_v30  ;;  %v2164_v34 = vrot.slane %v2150_v31, %v4255_v7 }
  0x25   : > { %3795 = vmatmul.mubr.msk.bf16.vlgmr.msra.gmra.mxu0 %vm322_vm2, %v301_v48  ;;  %3962 = vmatmul.mubr.msk.bf16.vlgmr.msra.gmra.mxu1 %vm322_vm2, %v301_v48  ;;  %v2289_v37 = vcombine.high %v2281_v35, %v2281_v35  ;;  %v2406_v40 = vrot.slane %v2397_v38, %v4255_v7  ;;  %v2399_v41 = vcombine.high %v2397_v38, %v2397_v38  ;;  %v4192_v48 = vmov 1   ;;  %v3817_v38 = vld [vmem:[%s4831_s3 + $0x6] sm:$0x3] }
  0x26   : > { %600 = vmatprep.mubr.bf16.mxu0 %v4181_v3  ;;  %3967 = vmatprep.mubr.msk.bf16.mxu1 %vm4183_vm0, %v4182_v5 }
  0x27   : > { %v2413_v43 = vrot.slane %v2399_v41, %v4255_v7  ;;  %4142 = vset.pattern.permute.xlu1 %v4192_v48 }
  0x28   : > { %923 = vrot.lane.b32.xlu0 %v920_v39, %s4185_s11  ;;  %925 = vrot.lane.b32.xlu1 %v919_v42, %s4185_s11  ;;  %v2288_v39 = vrot.slane %v2274_v36, %v4255_v7  ;;  %v2414_v42 = vcombine.high %v2406_v40, %v2406_v40 }
  0x2c   : > { %1045 = vrot.lane.b32.xlu0 %v1036_v44, %s4186_s16  ;;  %1047 = vrot.lane.b32.xlu1 %v1044_v46, %s4186_s16  ;;  %v2519_v46 = vld [vmem:[%s4833_s5] sm:$0xf] }
  0x30   : > { %1049 = vrot.lane.b32.xlu0 %v1043_v49, %s4186_s16  ;;  %1170 = vrot.lane.b32.xlu1 %v1161_v50, %s4186_s16  ;;  %v3797_v50 = vld [vmem:[%s4830_s2 + $0x2] sm:$0x3] }
  0x34   : > { %1172 = vrot.lane.b32.xlu0 %v1169_v52, %s4186_s16  ;;  %1174 = vrot.lane.b32.xlu1 %v1168_v54, %s4186_s16 }
  0x38   : > { %1294 = vrot.lane.b32.xlu0 %v1285_v55, %s4187_s17  ;;  %1296 = vrot.lane.b32.xlu1 %v1293_v57, %s4187_s17 }
  0x3c   : > { %1298 = vrot.lane.b32.xlu0 %v1292_v59, %s4187_s17  ;;  %1419 = vrot.lane.b32.xlu1 %v1410_v60, %s4187_s17 }
  0x40   : > { %1421 = vrot.lane.b32.xlu0 %v1418_v62, %s4187_s17  ;;  %1423 = vrot.lane.b32.xlu1 %v1417_v0, %s4187_s17  ;;  %v3801_v62 = vld [vmem:[%s4831_s3 + $0x2] sm:$0x3] }
  0x44   : > { %1543 = vrot.lane.b32.xlu0 %v1534_v1, %s4188_s18  ;;  %1545 = vrot.lane.b32.xlu1 %v1542_v6, %s4188_s18 }
  0x48   : > { %1547 = vrot.lane.b32.xlu0 %v1541_v9, %s4188_s18  ;;  %1668 = vrot.lane.b32.xlu1 %v1659_v10, %s4188_s18  ;;  %v3805_v10 = vld [vmem:[%s4830_s2 + $0x4] sm:$0x3] }
  0x4c   : > { %1670 = vrot.lane.b32.xlu0 %v1667_v12, %s4188_s18  ;;  %1672 = vrot.lane.b32.xlu1 %v1666_v14, %s4188_s18 }
  0x50   : > { %1792 = vrot.lane.b32.xlu0 %v1783_v15, %s4189_s19  ;;  %1794 = vrot.lane.b32.xlu1 %v1791_v17, %s4189_s19 }
  0x54   : > { %1796 = vrot.lane.b32.xlu0 %v1790_v19, %s4189_s19  ;;  %1917 = vrot.lane.b32.xlu1 %v1908_v20, %s4189_s19  ;;  %v3809_v19 = vld [vmem:[%s4831_s3 + $0x4] sm:$0x3] }
  0x58   : > { %1919 = vrot.lane.b32.xlu0 %v1916_v22, %s4189_s19  ;;  %1921 = vrot.lane.b32.xlu1 %v1915_v24, %s4189_s19 }
  0x5c   : > { %2041 = vrot.lane.b32.xlu0 %v2032_v25, %s4190_s20  ;;  %2043 = vrot.lane.b32.xlu1 %v2040_v27, %s4190_s20 }
  0x60   : > { %2045 = vrot.lane.b32.xlu0 %v2039_v29, %s4190_s20  ;;  %2166 = vrot.lane.b32.xlu1 %v2157_v30, %s4190_s20  ;;  %v3813_v29 = vld [vmem:[%s4830_s2 + $0x6] sm:$0x3] }
  0x64   : > { %2168 = vrot.lane.b32.xlu0 %v2165_v32, %s4190_s20  ;;  %2170 = vrot.lane.b32.xlu1 %v2164_v34, %s4190_s20 }
  0x68   : > { %2290 = vrot.lane.b32.xlu0 %v2281_v35, %s4191_s21  ;;  %2292 = vrot.lane.b32.xlu1 %v2289_v37, %s4191_s21 }
  0x6c   : > { %2294 = vrot.lane.b32.xlu0 %v2288_v39, %s4191_s21  ;;  %2415 = vrot.lane.b32.xlu1 %v2406_v40, %s4191_s21 }
  0x70   : > { %2417 = vrot.lane.b32.xlu0 %v2414_v42, %s4191_s21  ;;  %2419 = vrot.lane.b32.xlu1 %v2413_v43, %s4191_s21 }
  0x74   : > { %2522 = vperm.xlu0 %4141, %v2519_v46   ;;  %2529 = vperm.xlu1 %4142, %v2519_v46  }
  0x86   : > { %v548_v44 = vpop.permute.xlu0 %547  ;;  %v552_v45 = vpop.permute.xlu1 %551 }
  0x87   : > { %v566_v47 = vsel %vm326_vm1, %v552_v45, 0 }
  0x88   : > { %3966 = vmatpush3.bf16.msra.mxu1 %v566_v47  ;;  %v3821_v47 = vld [vmem:[%s4830_s2 + $0x8] sm:$0x3] }
  0x89   : > { %3971 = vmatprep.subr.bf16.mxu1 %v4182_v5 }
  0x8a   : > { %v550_v49 = vpop.permute.xlu0 %549  ;;  %v673_v54 = vpop.permute.xlu1 %672 }
  0x8b   : > { %v554_v51 = vsel %vm553_vm3, %v548_v44, %v550_v49  ;;  %v555_v52 = vsel %vm553_vm3, %v550_v49, %v552_v45  ;;  %3968 = vmatmul.mubr.msk.bf16.vlgmr.msra.gmra.mxu1 %vm322_vm2, %v3797_v50 }
  0x8c   : > { %v560_v53 = vsel %vm326_vm1, %v554_v51, 0  ;;  %3798 = vmatprep.subr.msk.bf16.mxu0 %vm326_vm1, %v555_v52  ;;  %3973 = vmatprep.mubr.msk.bf16.mxu1 %vm4183_vm0, %v4182_v5 }
  0x8d   : > { %583 = vmatpush1.bf16.msra.mxu0 %v560_v53 }
  0x8e   : > { %v675_v55 = vpop.permute.xlu0 %674  ;;  %v677_v57 = vpop.permute.xlu1 %676 }
  0x8f   : > { %v678_v56 = vsel %vm553_vm3, %v673_v54, %v675_v55  ;;  %v679_v58 = vsel %vm553_vm3, %v675_v55, %v677_v57  ;;  %v690_v59 = vsel %vm326_vm1, %v677_v57, 0  ;;  %v3825_v55 = vld [vmem:[%s4831_s3 + $0x8] sm:$0x3] }
  0x90   : > { %3799 = vmatmul.mubr.msk.bf16.vlgmr.msra.gmra.mxu0 %vm322_vm2, %v3797_v50  ;;  %v684_v60 = vsel %vm326_vm1, %v678_v56, 0  ;;  %3802 = vmatprep.subr.msk.bf16.mxu0 %vm326_vm1, %v679_v58 }
  0x91   : > { %724 = vmatprep.mubr.bf16.mxu0 %v4181_v3  ;;  %3972 = vmatpush3.bf16.msra.mxu1 %v690_v59 }
  0x92   : > { %v797_v61 = vpop.permute.xlu0 %796  ;;  %707 = vmatpush1.bf16.msra.mxu0 %v684_v60  ;;  %3977 = vmatprep.subr.bf16.mxu1 %v4182_v5  ;;  %v799_v63 = vpop.permute.xlu1 %798 }
  0x93   : > { %v803_v0 = vsel %vm802_vm4, %v797_v61, %v799_v63 }
  0x94   : > { %3974 = vmatmul.mubr.msk.bf16.vlgmr.msra.gmra.mxu1 %vm322_vm2, %v3801_v62  ;;  %v809_v2 = vsel %vm326_vm1, %v803_v0, 0 }
  0x95   : > { %3979 = vmatprep.mubr.msk.bf16.mxu1 %vm4183_vm0, %v4182_v5 }
  0x96   : > { %v801_v1 = vpop.permute.xlu0 %800  ;;  %v922_v9 = vpop.permute.xlu1 %921 }
  0x97   : > { %v815_v6 = vsel %vm326_vm1, %v801_v1, 0  ;;  %v804_v8 = vsel %vm802_vm4, %v799_v63, %v801_v1  ;;  %v3829_v63 = vld [vmem:[%s4830_s2 + $0xa] sm:$0x3] }
  0x98   : > { %3803 = vmatmul.mubr.msk.bf16.vlgmr.msra.gmra.mxu0 %vm322_vm2, %v3801_v62  ;;  %3806 = vmatprep.subr.msk.bf16.mxu0 %vm326_vm1, %v804_v8 }
  0x99   : > { %832 = vmatpush1.bf16.msra.mxu0 %v809_v2  ;;  %3978 = vmatpush3.bf16.msra.mxu1 %v815_v6 }
  0x9a   : > { %v924_v11 = vpop.permute.xlu0 %923  ;;  %849 = vmatprep.mubr.bf16.mxu0 %v4181_v3  ;;  %3983 = vmatprep.subr.bf16.mxu1 %v4182_v5  ;;  %v926_v13 = vpop.permute.xlu1 %925 }
  0x9b   : > { %v927_v12 = vsel %vm802_vm4, %v922_v9, %v924_v11  ;;  %v928_v14 = vsel %vm802_vm4, %v924_v11, %v926_v13  ;;  %v939_v15 = vsel %vm326_vm1, %v926_v13, 0  ;;  %v3833_v11 = vld [vmem:[%s4831_s3 + $0xa] sm:$0x3] }
  0x9c   : > { %3980 = vmatmul.mubr.msk.bf16.vlgmr.msra.gmra.mxu1 %vm322_vm2, %v3805_v10  ;;  %v933_v16 = vsel %vm326_vm1, %v927_v12, 0  ;;  %3810 = vmatprep.subr.msk.bf16.mxu0 %vm326_vm1, %v928_v14 }
  0x9d   : > { %3984 = vmatpush3.bf16.msra.mxu1 %v939_v15  ;;  %3985 = vmatprep.mubr.msk.bf16.mxu1 %vm4183_vm0, %v4182_v5 }
  0x9e   : > { %v1046_v17 = vpop.permute.xlu0 %1045  ;;  %3989 = vmatprep.subr.bf16.mxu1 %v4182_v5  ;;  %v1048_v18 = vpop.permute.xlu1 %1047 }
  0x9f   : > { %v1052_v22 = vsel %vm1051_vm5, %v1046_v17, %v1048_v18 }
  0xa0   : > { %3807 = vmatmul.mubr.msk.bf16.vlgmr.msra.gmra.mxu0 %vm322_vm2, %v3805_v10  ;;  %v1058_v25 = vsel %vm326_vm1, %v1052_v22, 0 }
  0xa1   : > { %956 = vmatpush1.bf16.msra.mxu0 %v933_v16  ;;  %973 = vmatprep.mubr.bf16.mxu0 %v4181_v3 }
  0xa2   : > { %v1050_v20 = vpop.permute.xlu0 %1049  ;;  %v1171_v24 = vpop.permute.xlu1 %1170 }
  0xa3   : > { %v1064_v21 = vsel %vm326_vm1, %v1050_v20, 0  ;;  %v1053_v23 = vsel %vm1051_vm5, %v1048_v18, %v1050_v20 }
  0xa4   : > { %3814 = vmatprep.subr.msk.bf16.mxu0 %vm326_vm1, %v1053_v23  ;;  %3986 = vmatmul.mubr.msk.bf16.vlgmr.msra.gmra.mxu1 %vm322_vm2, %v3809_v19 }
  0xa5   : > { %3990 = vmatpush3.bf16.msra.mxu1 %v1064_v21  ;;  %3991 = vmatprep.mubr.msk.bf16.mxu1 %vm4183_vm0, %v4182_v5 }
  0xa6   : > { %v1173_v26 = vpop.permute.xlu0 %1172  ;;  %3995 = vmatprep.subr.bf16.mxu1 %v4182_v5  ;;  %v1175_v27 = vpop.permute.xlu1 %1174 }
  0xa7   : > { %v1177_v28 = vsel %vm1051_vm5, %v1173_v26, %v1175_v27  ;;  %v1176_v31 = vsel %vm1051_vm5, %v1171_v24, %v1173_v26  ;;  %v1188_v32 = vsel %vm326_vm1, %v1175_v27, 0  ;;  %v3841_v27 = vld [vmem:[%s4831_s3 + $0xc] sm:$0x3] }
  0xa8   : > { %3811 = vmatmul.mubr.msk.bf16.vlgmr.msra.gmra.mxu0 %vm322_vm2, %v3809_v19  ;;  %v1182_v34 = vsel %vm326_vm1, %v1176_v31, 0  ;;  %v3837_v19 = vld [vmem:[%s4830_s2 + $0xc] sm:$0x3] }
  0xa9   : > { %1081 = vmatpush1.bf16.msra.mxu0 %v1058_v25  ;;  %1098 = vmatprep.mubr.bf16.mxu0 %v4181_v3 }
  0xaa   : > { %3818 = vmatprep.subr.msk.bf16.mxu0 %vm326_vm1, %v1177_v28  ;;  %v1295_v30 = vpop.permute.xlu0 %1294  ;;  %v1297_v33 = vpop.permute.xlu1 %1296 }
  0xab   : > { %v1301_v41 = vsel %vm1300_vm6, %v1295_v30, %v1297_v33 }
  0xac   : > { %3992 = vmatmul.mubr.msk.bf16.vlgmr.msra.gmra.mxu1 %vm322_vm2, %v3813_v29  ;;  %v1307_v43 = vsel %vm326_vm1, %v1301_v41, 0 }
  0xad   : > { %3996 = vmatpush3.bf16.msra.mxu1 %v1188_v32  ;;  %3997 = vmatprep.mubr.msk.bf16.mxu1 %vm4183_vm0, %v4182_v5 }
  0xae   : > { %v1299_v35 = vpop.permute.xlu0 %1298  ;;  %4001 = vmatprep.subr.bf16.mxu1 %v4182_v5  ;;  %v1420_v37 = vpop.permute.xlu1 %1419 }
  0xaf   : > { %v1302_v36 = vsel %vm1300_vm6, %v1297_v33, %v1299_v35  ;;  %v1313_v40 = vsel %vm326_vm1, %v1299_v35, 0 }
  0xb0   : > { %3815 = vmatmul.mubr.msk.bf16.vlgmr.msra.gmra.mxu0 %vm322_vm2, %v3813_v29 }
  0xb1   : > { %1205 = vmatpush1.bf16.msra.mxu0 %v1182_v34  ;;  %1222 = vmatprep.mubr.bf16.mxu0 %v4181_v3 }
  0xb2   : > { %3822 = vmatprep.subr.msk.bf16.mxu0 %vm326_vm1, %v1302_v36  ;;  %v1422_v39 = vpop.permute.xlu0 %1421  ;;  %v1424_v42 = vpop.permute.xlu1 %1423 }
  0xb3   : > { %v1426_v45 = vsel %vm1300_vm6, %v1422_v39, %v1424_v42  ;;  %v1425_v48 = vsel %vm1300_vm6, %v1420_v37, %v1422_v39  ;;  %v1437_v49 = vsel %vm326_vm1, %v1424_v42, 0  ;;  %v3845_v39 = vld [vmem:[%s4830_s2 + $0xe] sm:$0x3] }
  0xb4   : > { %3998 = vmatmul.mubr.msk.bf16.vlgmr.msra.gmra.mxu1 %vm322_vm2, %v3817_v38  ;;  %v1431_v51 = vsel %vm326_vm1, %v1425_v48, 0 }
  0xb5   : > { %4002 = vmatpush3.bf16.msra.mxu1 %v1313_v40  ;;  %4003 = vmatprep.mubr.msk.bf16.mxu1 %vm4183_vm0, %v4182_v5 }
  0xb6   : > { %v1544_v44 = vpop.permute.xlu0 %1543  ;;  %4007 = vmatprep.subr.bf16.mxu1 %v4182_v5  ;;  %v1546_v46 = vpop.permute.xlu1 %1545 }
  0xb7   : > { %v1550_v57 = vsel %vm1549_vm7, %v1544_v44, %v1546_v46 }
  0xb8   : > { %3819 = vmatmul.mubr.msk.bf16.vlgmr.msra.gmra.mxu0 %vm322_vm2, %v3817_v38  ;;  %v1556_v59 = vsel %vm326_vm1, %v1550_v57, 0  ;;  %v3849_v57 = vld [vmem:[%s4831_s3 + $0xe] sm:$0x3] }
  0xb9   : > { %1330 = vmatpush1.bf16.msra.mxu0 %v1307_v43  ;;  %1347 = vmatprep.mubr.bf16.mxu0 %v4181_v3 }
  0xba   : > { %3826 = vmatprep.subr.msk.bf16.mxu0 %vm326_vm1, %v1426_v45  ;;  %v1548_v50 = vpop.permute.xlu0 %1547  ;;  %v1669_v52 = vpop.permute.xlu1 %1668 }
  0xbb   : > { %v1551_v53 = vsel %vm1549_vm7, %v1546_v46, %v1548_v50  ;;  %v1562_v56 = vsel %vm326_vm1, %v1548_v50, 0 }
  0xbc   : > { %4004 = vmatmul.mubr.msk.bf16.vlgmr.msra.gmra.mxu1 %vm322_vm2, %v3821_v47 }
  0xbd   : > { %4008 = vmatpush3.bf16.msra.mxu1 %v1437_v49  ;;  %4009 = vmatprep.mubr.msk.bf16.mxu1 %vm4183_vm0, %v4182_v5 }
  0xbe   : > { %4013 = vmatprep.subr.bf16.mxu1 %v4182_v5  ;;  %v1671_v54 = vpop.permute.xlu0 %1670  ;;  %v1673_v58 = vpop.permute.xlu1 %1672 }
  0xbf   : > { %v1675_v61 = vsel %vm1549_vm7, %v1671_v54, %v1673_v58  ;;  %v1674_v0 = vsel %vm1549_vm7, %v1669_v52, %v1671_v54  ;;  %v1686_v1 = vsel %vm326_vm1, %v1673_v58, 0 }
  0xc0   : > { %3823 = vmatmul.mubr.msk.bf16.vlgmr.msra.gmra.mxu0 %vm322_vm2, %v3821_v47  ;;  %v1680_v6 = vsel %vm326_vm1, %v1674_v0, 0 }
  0xc1   : > { %1454 = vmatpush1.bf16.msra.mxu0 %v1431_v51  ;;  %1471 = vmatprep.mubr.bf16.mxu0 %v4181_v3 }
  0xc2   : > { %3830 = vmatprep.subr.msk.bf16.mxu0 %vm326_vm1, %v1551_v53  ;;  %v1793_v60 = vpop.permute.xlu0 %1792  ;;  %v1795_v62 = vpop.permute.xlu1 %1794 }
  0xc3   : > { %v1799_v13 = vsel %vm1798_vm8, %v1793_v60, %v1795_v62 }
  0xc4   : > { %4010 = vmatmul.mubr.msk.bf16.vlgmr.msra.gmra.mxu1 %vm322_vm2, %v3825_v55  ;;  %v1805_v15 = vsel %vm326_vm1, %v1799_v13, 0 }
  0xc5   : > { %4014 = vmatpush3.bf16.msra.mxu1 %v1562_v56  ;;  %4015 = vmatprep.mubr.msk.bf16.mxu1 %vm4183_vm0, %v4182_v5 }
  0xc6   : > { %4019 = vmatprep.subr.bf16.mxu1 %v4182_v5  ;;  %v1797_v2 = vpop.permute.xlu0 %1796  ;;  %v1918_v8 = vpop.permute.xlu1 %1917 }
  0xc7   : > { %v1800_v9 = vsel %vm1798_vm8, %v1795_v62, %v1797_v2  ;;  %v1811_v12 = vsel %vm326_vm1, %v1797_v2, 0 }
  0xc8   : > { %3827 = vmatmul.mubr.msk.bf16.vlgmr.msra.gmra.mxu0 %vm322_vm2, %v3825_v55 }
  0xc9   : > { %1579 = vmatpush1.bf16.msra.mxu0 %v1556_v59  ;;  %1596 = vmatprep.mubr.bf16.mxu0 %v4181_v3 }
  0xca   : > { %3834 = vmatprep.subr.msk.bf16.mxu0 %vm326_vm1, %v1675_v61  ;;  %v1920_v10 = vpop.permute.xlu0 %1919  ;;  %v1922_v14 = vpop.permute.xlu1 %1921 }
  0xcb   : > { %v1924_v17 = vsel %vm1798_vm8, %v1920_v10, %v1922_v14  ;;  %v1923_v20 = vsel %vm1798_vm8, %v1918_v8, %v1920_v10  ;;  %v1935_v21 = vsel %vm326_vm1, %v1922_v14, 0  ;;  %v3853_v8 = vld [vmem:[%s4830_s2 + $0x10] sm:$0x3] }
  0xcc   : > { %4016 = vmatmul.mubr.msk.bf16.vlgmr.msra.gmra.mxu1 %vm322_vm2, %v3829_v63  ;;  %v1929_v23 = vsel %vm326_vm1, %v1923_v20, 0 }
  0xcd   : > { %4020 = vmatpush3.bf16.msra.mxu1 %v1686_v1  ;;  %4021 = vmatprep.mubr.msk.bf16.mxu1 %vm4183_vm0, %v4182_v5 }
  0xce   : > { %4025 = vmatprep.subr.bf16.mxu1 %v4182_v5  ;;  %v2042_v16 = vpop.permute.xlu0 %2041  ;;  %v2044_v18 = vpop.permute.xlu1 %2043 }
  0xcf   : > { %v2048_v29 = vsel %vm4837_vm9, %v2042_v16, %v2044_v18 }
  0xd0   : > { %3831 = vmatmul.mubr.msk.bf16.vlgmr.msra.gmra.mxu0 %vm322_vm2, %v3829_v63  ;;  %v2054_v31 = vsel %vm326_vm1, %v2048_v29, 0 }
  0xd1   : > { %1703 = vmatpush1.bf16.msra.mxu0 %v1680_v6  ;;  %1720 = vmatprep.mubr.bf16.mxu0 %v4181_v3 }
  0xd2   : > { %3838 = vmatprep.subr.msk.bf16.mxu0 %vm326_vm1, %v1800_v9  ;;  %v2046_v22 = vpop.permute.xlu0 %2045  ;;  %v2167_v24 = vpop.permute.xlu1 %2166 }
  0xd3   : > { %v2049_v25 = vsel %vm4837_vm9, %v2044_v18, %v2046_v22  ;;  %v2060_v28 = vsel %vm326_vm1, %v2046_v22, 0 }
  0xd4   : > { %4022 = vmatmul.mubr.msk.bf16.vlgmr.msra.gmra.mxu1 %vm322_vm2, %v3833_v11 }
  0xd5   : > { %4026 = vmatpush3.bf16.msra.mxu1 %v1811_v12  ;;  %4027 = vmatprep.mubr.msk.bf16.mxu1 %vm4183_vm0, %v4182_v5  ;;  %v3857_v12 = vld [vmem:[%s4831_s3 + $0x10] sm:$0x3] }
  0xd6   : > { %4031 = vmatprep.subr.bf16.mxu1 %v4182_v5  ;;  %v2169_v26 = vpop.permute.xlu0 %2168  ;;  %v2171_v30 = vpop.permute.xlu1 %2170 }
  0xd7   : > { %v2173_v34 = vsel %vm4837_vm9, %v2169_v26, %v2171_v30  ;;  %v2172_v41 = vsel %vm4837_vm9, %v2167_v24, %v2169_v26  ;;  %v2184_v42 = vsel %vm326_vm1, %v2171_v30, 0  ;;  %vm2593_vm9 = vcmask 154624  }
  0xd8   : > { %3835 = vmatmul.mubr.msk.bf16.vlgmr.msra.gmra.mxu0 %vm322_vm2, %v3833_v11  ;;  %v2178_v47 = vsel %vm326_vm1, %v2172_v41, 0 }
  0xd9   : > { %1828 = vmatpush1.bf16.msra.mxu0 %v1805_v15  ;;  %1845 = vmatprep.mubr.bf16.mxu0 %v4181_v3 }
  0xda   : > { %3842 = vmatprep.subr.msk.bf16.mxu0 %vm326_vm1, %v1924_v17  ;;  %v2291_v32 = vpop.permute.xlu0 %2290  ;;  %v2293_v36 = vpop.permute.xlu1 %2292 }
  0xdb   : > { %v2297_v60 = vsel %vm4836_vm10, %v2291_v32, %v2293_v36 }
  0xdc   : > { %4028 = vmatmul.mubr.msk.bf16.vlgmr.msra.gmra.mxu1 %vm322_vm2, %v3837_v19  ;;  %v2303_v2 = vsel %vm326_vm1, %v2297_v60, 0 }
  0xdd   : > { %4032 = vmatpush3.bf16.msra.mxu1 %v1935_v21  ;;  %4033 = vmatprep.mubr.msk.bf16.mxu1 %vm4183_vm0, %v4182_v5  ;;  %v370_v33 = vpop.f32.mrf.mxu0  ;;  %v411_v35 = vpop.f32.mrf.mxu1 }
  0xde   : > { %4037 = vmatprep.subr.bf16.mxu1 %v4182_v5  ;;  %v2295_v44 = vpop.permute.xlu0 %2294  ;;  %v2416_v48 = vpop.permute.xlu1 %2415 }
  0xdf   : > { %v372_v37 = vpop.f32.mrf.mxu0  ;;  %v3957_v38 = vpop.f32.mrf.mxu1  ;;  %v2298_v50 = vsel %vm4836_vm10, %v2293_v36, %v2295_v44  ;;  %v2309_v59 = vsel %vm326_vm1, %v2295_v44, 0 }
  0xe0   : > { %3839 = vmatmul.mubr.msk.bf16.vlgmr.msra.gmra.mxu0 %vm322_vm2, %v3837_v19 }
  0xe1   : > { %1952 = vmatpush1.bf16.msra.mxu0 %v1929_v23  ;;  %1969 = vmatprep.mubr.bf16.mxu0 %v4181_v3  ;;  %v374_v40 = vpop.f32.mrf.mxu0  ;;  %v414_v43 = vpop.f32.mrf.mxu1 }
  0xe2   : > { %3846 = vmatprep.subr.msk.bf16.mxu0 %vm326_vm1, %v2049_v25  ;;  %v2418_v61 = vpop.permute.xlu0 %2417  ;;  %v2420_v63 = vpop.permute.xlu1 %2419 }
  0xe3   : > { %v375_v45 = vpop.f32.mrf.mxu0  ;;  %v3958_v46 = vpop.f32.mrf.mxu1  ;;  %v2422_v6 = vsel %vm4836_vm10, %v2418_v61, %v2420_v63  ;;  %v2421_v9 = vsel %vm4836_vm10, %v2416_v48, %v2418_v61  ;;  %v2433_v10 = vsel %vm326_vm1, %v2420_v63, 0  ;;  %vm2598_vm10 = vcmask 709636  }
  0xe4   : > { %4034 = vmatmul.mubr.msk.bf16.vlgmr.msra.gmra.mxu1 %vm322_vm2, %v3841_v27  ;;  %v2427_v11 = vsel %vm326_vm1, %v2421_v9, 0 }
  0xe5   : > { %4038 = vmatpush3.bf16.msra.mxu1 %v2060_v28  ;;  %4039 = vmatprep.mubr.msk.bf16.mxu1 %vm4183_vm0, %v4182_v5  ;;  %v480_v49 = vpop.f32.mrf.mxu0  ;;  %v521_v52 = vpop.f32.mrf.mxu1 }
  0xe6   : > { %4043 = vmatprep.subr.bf16.mxu1 %v4182_v5  ;;  %v481_v51 = vadd.f32 %v480_v49, %v370_v33  ;;  %v522_v54 = vadd.f32 %v521_v52, %v411_v35 }
  0xe7   : > { %v482_v53 = vpop.f32.mrf.mxu0  ;;  %v3963_v56 = vpop.f32.mrf.mxu1 }
  0xe8   : > { %3843 = vmatmul.mubr.msk.bf16.vlgmr.msra.gmra.mxu0 %vm322_vm2, %v3841_v27  ;;  %v483_v55 = vadd.f32 %v482_v53, %v372_v37 }
  0xe9   : > { %2077 = vmatpush1.bf16.msra.mxu0 %v2054_v31  ;;  %2094 = vmatprep.mubr.bf16.mxu0 %v4181_v3  ;;  %v484_v58 = vpop.f32.mrf.mxu0  ;;  %v524_v62 = vpop.f32.mrf.mxu1 }
  0xea   : > { %3850 = vmatprep.subr.msk.bf16.mxu0 %vm326_vm1, %v2173_v34 }
  0xeb   : > { %v485_v0 = vpop.f32.mrf.mxu0  ;;  %v3964_v1 = vpop.f32.mrf.mxu1 }
  0xec   : > { %4040 = vmatmul.mubr.msk.bf16.vlgmr.msra.gmra.mxu1 %vm322_vm2, %v3845_v39 }
  0xed   : > { %4044 = vmatpush3.bf16.msra.mxu1 %v2184_v42  ;;  %4045 = vmatprep.mubr.msk.bf16.mxu1 %vm4183_vm0, %v4182_v5 }
  0xee   : > { %4049 = vmatprep.subr.bf16.mxu1 %v4182_v5 }
  0xf0   : > { %3847 = vmatmul.mubr.msk.bf16.vlgmr.msra.gmra.mxu0 %vm322_vm2, %v3845_v39 }
  0xf1   : > { %2201 = vmatpush1.bf16.msra.mxu0 %v2178_v47  ;;  %2218 = vmatprep.mubr.bf16.mxu0 %v4181_v3 }
  0xf2   : > { %3854 = vmatprep.subr.msk.bf16.mxu0 %vm326_vm1, %v2298_v50 }
  0xf4   : > { %4046 = vmatmul.mubr.msk.bf16.vlgmr.msra.gmra.mxu1 %vm322_vm2, %v3849_v57 }
  0xf5   : > { %4050 = vmatpush3.bf16.msra.mxu1 %v2309_v59  ;;  %4051 = vmatprep.mubr.msk.bf16.mxu1 %vm4183_vm0, %v4182_v5 }
  0xf6   : > { %4055 = vmatprep.subr.bf16.mxu1 %v4182_v5 }
  0xf8   : > { %3851 = vmatmul.mubr.msk.bf16.vlgmr.msra.gmra.mxu0 %vm322_vm2, %v3849_v57 }
  0xf9   : > { %2326 = vmatpush1.bf16.msra.mxu0 %v2303_v2  ;;  %2343 = vmatprep.mubr.bf16.mxu0 %v4181_v3 }
  0xfa   : > { %3858 = vmatprep.subr.msk.bf16.mxu0 %vm326_vm1, %v2422_v6 }
  0xfc   : > { %4052 = vmatmul.mubr.msk.bf16.vlgmr.msra.gmra.mxu1 %vm322_vm2, %v3853_v8 }
  0xfd   : > { %4056 = vmatpush3.bf16.msra.mxu1 %v2433_v10  ;;  %4057 = vmatprep.mubr.msk.bf16.mxu1 %vm4183_vm0, %v4182_v5 }
  0xfe   : > { %4061 = vmatprep.subr.bf16.mxu1 %v4182_v5 }
 0x100   : > { %3855 = vmatmul.mubr.msk.bf16.vlgmr.msra.gmra.mxu0 %vm322_vm2, %v3853_v8 }
 0x101   : > { %2450 = vmatpush1.bf16.msra.mxu0 %v2427_v11  ;;  %2467 = vmatprep.mubr.bf16.mxu0 %v4181_v3 }
 0x104   : > { %4058 = vmatmul.mubr.msk.bf16.vlgmr.msra.gmra.mxu1 %vm322_vm2, %v3857_v12 }
 0x105   : > { %4063 = vmatprep.mubr.msk.bf16.mxu1 %vm4183_vm0, %v4182_v5 }
 0x108   : > { %3859 = vmatmul.mubr.msk.bf16.vlgmr.msra.gmra.mxu0 %vm322_vm2, %v3857_v12 }
 0x109   : > { %2674 = vmatprep.mubr.bf16.mxu0 %v4181_v3 }
 0x14b   : > { %v643_v13 = vpop.f32.mrf.mxu1 }
 0x14c   : > { %v651_v14 = vadd.f32 %v643_v13, %v522_v54 }
 0x14d   : > { %v3969_v15 = vpop.f32.mrf.mxu1 }
 0x14f   : > { %v646_v18 = vpop.f32.mrf.mxu1 }
 0x150   : > { %v602_v16 = vpop.f32.mrf.mxu0 }
 0x151   : > { %v649_v17 = vadd.f32 %v602_v16, %v481_v51  ;;  %v3970_v21 = vpop.f32.mrf.mxu1 }
 0x152   : > { %v604_v19 = vpop.f32.mrf.mxu0 }
 0x153   : > { %v650_v20 = vadd.f32 %v604_v19, %v483_v55 }
 0x154   : > { %v606_v22 = vpop.f32.mrf.mxu0  ;;  %v767_v23 = vpop.f32.mrf.mxu1 }
 0x155   : > { %v775_v24 = vadd.f32 %v767_v23, %v651_v14 }
 0x156   : > { %v607_v25 = vpop.f32.mrf.mxu0  ;;  %v3975_v26 = vpop.f32.mrf.mxu1 }
 0x158   : > { %v726_v27 = vpop.f32.mrf.mxu0  ;;  %v770_v29 = vpop.f32.mrf.mxu1 }
 0x159   : > { %v773_v28 = vadd.f32 %v726_v27, %v649_v17 }
 0x15a   : > { %v728_v30 = vpop.f32.mrf.mxu0  ;;  %v3976_v32 = vpop.f32.mrf.mxu1 }
 0x15b   : > { %v774_v31 = vadd.f32 %v728_v30, %v650_v20 }
 0x15c   : > { %v730_v33 = vpop.f32.mrf.mxu0  ;;  %v892_v34 = vpop.f32.mrf.mxu1 }
 0x15d   : > { %v900_v35 = vadd.f32 %v892_v34, %v775_v24 }
 0x15e   : > { %v731_v36 = vpop.f32.mrf.mxu0  ;;  %v3981_v37 = vpop.f32.mrf.mxu1 }
 0x160   : > { %v851_v38 = vpop.f32.mrf.mxu0  ;;  %v895_v40 = vpop.f32.mrf.mxu1 }
 0x161   : > { %v898_v39 = vadd.f32 %v851_v38, %v773_v28 }
 0x162   : > { %v853_v41 = vpop.f32.mrf.mxu0  ;;  %v3982_v43 = vpop.f32.mrf.mxu1 }
 0x163   : > { %v899_v42 = vadd.f32 %v853_v41, %v774_v31 }
 0x164   : > { %v855_v44 = vpop.f32.mrf.mxu0  ;;  %v1016_v45 = vpop.f32.mrf.mxu1 }
 0x165   : > { %v1024_v46 = vadd.f32 %v1016_v45, %v900_v35 }
 0x166   : > { %v856_v47 = vpop.f32.mrf.mxu0  ;;  %v3987_v48 = vpop.f32.mrf.mxu1 }
 0x168   : > { %v975_v49 = vpop.f32.mrf.mxu0  ;;  %v1019_v51 = vpop.f32.mrf.mxu1 }
 0x169   : > { %v1022_v50 = vadd.f32 %v975_v49, %v898_v39 }
 0x16a   : > { %v977_v52 = vpop.f32.mrf.mxu0  ;;  %v3988_v54 = vpop.f32.mrf.mxu1 }
 0x16b   : > { %v1023_v53 = vadd.f32 %v977_v52, %v899_v42 }
 0x16c   : > { %v979_v55 = vpop.f32.mrf.mxu0  ;;  %v1141_v56 = vpop.f32.mrf.mxu1 }
 0x16d   : > { %v1149_v57 = vadd.f32 %v1141_v56, %v1024_v46 }
 0x16e   : > { %v980_v58 = vpop.f32.mrf.mxu0  ;;  %v3993_v59 = vpop.f32.mrf.mxu1 }
 0x170   : > { %v1100_v60 = vpop.f32.mrf.mxu0  ;;  %v1144_v62 = vpop.f32.mrf.mxu1 }
 0x171   : > { %v4623_v61 = vadd.f32 %v1100_v60, %v1022_v50 }
 0x172   : > { %v1102_v63 = vpop.f32.mrf.mxu0  ;;  %v3994_v1 = vpop.f32.mrf.mxu1 }
 0x173   : > { %v4625_v0 = vadd.f32 %v1102_v63, %v1023_v53 }
 0x174   : > { %v1104_v2 = vpop.f32.mrf.mxu0  ;;  %v1265_v6 = vpop.f32.mrf.mxu1 }
 0x175   : > { %v4627_v8 = vadd.f32 %v1265_v6, %v1149_v57 }
 0x176   : > { %v1105_v9 = vpop.f32.mrf.mxu0  ;;  %v3999_v10 = vpop.f32.mrf.mxu1 }
 0x178   : > { %v1224_v11 = vpop.f32.mrf.mxu0  ;;  %v1268_v12 = vpop.f32.mrf.mxu1 }
 0x17a   : > { %v4629_v13 = vpop.f32.mrf.mxu0  ;;  %v4000_v14 = vpop.f32.mrf.mxu1 }
 0x17c   : > { %v1228_v15 = vpop.f32.mrf.mxu0  ;;  %v1390_v16 = vpop.f32.mrf.mxu1 }
 0x17e   : > { %v1229_v17 = vpop.f32.mrf.mxu0  ;;  %v4005_v18 = vpop.f32.mrf.mxu1 }
 0x17f   : > { %v1398_v17 = vadd.f32 %v1390_v16, %v4627_v8 }
 0x180   : > { %v1349_v19 = vpop.f32.mrf.mxu0  ;;  %v1393_v20 = vpop.f32.mrf.mxu1 }
 0x181   : > { %v1271_v20 = vadd.f32 %v1224_v11, %v4623_v61 }
 0x182   : > { %v1351_v21 = vpop.f32.mrf.mxu0  ;;  %v4006_v22 = vpop.f32.mrf.mxu1 }
 0x184   : > { %v1353_v23 = vpop.f32.mrf.mxu0  ;;  %v1514_v24 = vpop.f32.mrf.mxu1 }
 0x185   : > { %v1522_v23 = vadd.f32 %v1514_v24, %v1398_v17 }
 0x186   : > { %v1354_v25 = vpop.f32.mrf.mxu0  ;;  %v4011_v26 = vpop.f32.mrf.mxu1 }
 0x187   : > { %v1272_v26 = vadd.f32 %v4629_v13, %v4625_v0 }
 0x188   : > { %v1473_v27 = vpop.f32.mrf.mxu0  ;;  %v1517_v28 = vpop.f32.mrf.mxu1 }
 0x189   : > { %v1396_v28 = vadd.f32 %v1349_v19, %v1271_v20 }
 0x18a   : > { %v1475_v29 = vpop.f32.mrf.mxu0  ;;  %v4012_v30 = vpop.f32.mrf.mxu1 }
 0x18c   : > { %v1477_v31 = vpop.f32.mrf.mxu0  ;;  %v1639_v32 = vpop.f32.mrf.mxu1 }
 0x18d   : > { %v1647_v31 = vadd.f32 %v1639_v32, %v1522_v23 }
 0x18e   : > { %v1478_v33 = vpop.f32.mrf.mxu0  ;;  %v4017_v34 = vpop.f32.mrf.mxu1 }
 0x18f   : > { %v1397_v34 = vadd.f32 %v1351_v21, %v1272_v26  ;;  %v2551_v26 = vsub.s32 1, %v4248_v4 }
 0x190   : > { %v1598_v35 = vpop.f32.mrf.mxu0  ;;  %v1642_v36 = vpop.f32.mrf.mxu1 }
 0x191   : > { %v1520_v36 = vadd.f32 %v1473_v27, %v1396_v28 }
 0x192   : > { %v1600_v37 = vpop.f32.mrf.mxu0  ;;  %v4018_v38 = vpop.f32.mrf.mxu1 }
 0x193   : > { %v1645_v8 = vadd.f32 %v1598_v35, %v1520_v36 }
 0x194   : > { %v1602_v39 = vpop.f32.mrf.mxu0  ;;  %v1763_v40 = vpop.f32.mrf.mxu1 }
 0x195   : > { %v1771_v39 = vadd.f32 %v1763_v40, %v1647_v31 }
 0x196   : > { %v1603_v41 = vpop.f32.mrf.mxu0  ;;  %v4023_v42 = vpop.f32.mrf.mxu1 }
 0x197   : > { %v1521_v42 = vadd.f32 %v1475_v29, %v1397_v34 }
 0x198   : > { %v1722_v43 = vpop.f32.mrf.mxu0  ;;  %v1766_v44 = vpop.f32.mrf.mxu1 }
 0x199   : > { %v1646_v11 = vadd.f32 %v1600_v37, %v1521_v42  ;;  %v1769_v24 = vadd.f32 %v1722_v43, %v1645_v8 }
 0x19a   : > { %v1724_v45 = vpop.f32.mrf.mxu0  ;;  %v4024_v46 = vpop.f32.mrf.mxu1 }
 0x19b   : > { %v1770_v0 = vadd.f32 %v1724_v45, %v1646_v11 }
 0x19c   : > { %v1726_v47 = vpop.f32.mrf.mxu0  ;;  %v1888_v48 = vpop.f32.mrf.mxu1 }
 0x19d   : > { %v1896_v44 = vadd.f32 %v1888_v48, %v1771_v39 }
 0x19e   : > { %v1727_v49 = vpop.f32.mrf.mxu0  ;;  %v4029_v50 = vpop.f32.mrf.mxu1 }
 0x1a0   : > { %v1847_v51 = vpop.f32.mrf.mxu0  ;;  %v1891_v52 = vpop.f32.mrf.mxu1 }
 0x1a1   : > { %v1894_v13 = vadd.f32 %v1847_v51, %v1769_v24 }
 0x1a2   : > { %v1849_v53 = vpop.f32.mrf.mxu0  ;;  %v4030_v54 = vpop.f32.mrf.mxu1 }
 0x1a3   : > { %v1895_v21 = vadd.f32 %v1849_v53, %v1770_v0 }
 0x1a4   : > { %v1851_v55 = vpop.f32.mrf.mxu0  ;;  %v2012_v56 = vpop.f32.mrf.mxu1 }
 0x1a5   : > { %v2020_v47 = vadd.f32 %v2012_v56, %v1896_v44  ;;  %v2523_v56 = vpop.permute.xlu0 %2522 }
 0x1a6   : > { %v1852_v57 = vpop.f32.mrf.mxu0  ;;  %v4035_v58 = vpop.f32.mrf.mxu1 }
 0x1a8   : > { %v1971_v59 = vpop.f32.mrf.mxu0  ;;  %v2015_v60 = vpop.f32.mrf.mxu1 }
 0x1a9   : > { %v2018_v27 = vadd.f32 %v1971_v59, %v1894_v13 }
 0x1aa   : > { %v1973_v62 = vpop.f32.mrf.mxu0  ;;  %v4036_v63 = vpop.f32.mrf.mxu1 }
 0x1ab   : > { %v2019_v29 = vadd.f32 %v1973_v62, %v1895_v21 }
 0x1ac   : > { %v1975_v1 = vpop.f32.mrf.mxu0  ;;  %v2137_v2 = vpop.f32.mrf.mxu1 }
 0x1ad   : > { %v2145_v32 = vadd.f32 %v2137_v2, %v2020_v47  ;;  %v2530_v2 = vpop.permute.xlu1 %2529 }
 0x1ae   : > { %v1976_v6 = vpop.f32.mrf.mxu0  ;;  %v4041_v9 = vpop.f32.mrf.mxu1 }
 0x1af   : > { %v2555_v6 = vsub.s32 2, %v4248_v4 }
 0x1b0   : > { %v2096_v10 = vpop.f32.mrf.mxu0  ;;  %v2140_v12 = vpop.f32.mrf.mxu1 }
 0x1b1   : > { %v2143_v35 = vadd.f32 %v2096_v10, %v2018_v27  ;;  %v300_v10 = vld [vmem:[%s4834_s6] sm:$0x7] }
 0x1b2   : > { %v2098_v14 = vpop.f32.mrf.mxu0  ;;  %v4042_v15 = vpop.f32.mrf.mxu1  ;;  %v2556_v28 = vrot.slane %v300_v10, %v2555_v6 }
 0x1b3   : > { %v2144_v37 = vadd.f32 %v2098_v14, %v2019_v29 }
 0x1b4   : > { %v2100_v18 = vpop.f32.mrf.mxu0  ;;  %v2261_v22 = vpop.f32.mrf.mxu1 }
 0x1b5   : > { %v2269_v40 = vadd.f32 %v2261_v22, %v2145_v32  ;;  %v2547_v18 = vsub.s32 0, %v4248_v4 }
 0x1b6   : > { %v2101_v25 = vpop.f32.mrf.mxu0  ;;  %v4047_v30 = vpop.f32.mrf.mxu1 }
 0x1b7   : > { %v2548_v39 = vrot.slane %v300_v10, %v2547_v18 }
 0x1b8   : > { %v2220_v33 = vpop.f32.mrf.mxu0  ;;  %v2264_v38 = vpop.f32.mrf.mxu1 }
 0x1b9   : > { %v2267_v43 = vadd.f32 %v2220_v33, %v2143_v35 }
 0x1ba   : > { %v2222_v41 = vpop.f32.mrf.mxu0  ;;  %v4048_v16 = vpop.f32.mrf.mxu1 }
 0x1bb   : > { %v2268_v51 = vadd.f32 %v2222_v41, %v2144_v37  ;;  %v2552_v41 = vrot.slane %v300_v10, %v2551_v26 }
 0x1bc   : > { %v2224_v61 = vpop.f32.mrf.mxu0  ;;  %v2386_v46 = vpop.f32.mrf.mxu1 }
 0x1bd   : > { %v2394_v48 = vadd.f32 %v2386_v46, %v2269_v40 }
 0x1be   : > { %v2225_v49 = vpop.f32.mrf.mxu0  ;;  %v4053_v19 = vpop.f32.mrf.mxu1 }
 0x1c0   : > { %v2345_v50 = vpop.f32.mrf.mxu0  ;;  %v2389_v52 = vpop.f32.mrf.mxu1 }
 0x1c1   : > { %v2392_v63 = vadd.f32 %v2345_v50, %v2267_v43 }
 0x1c2   : > { %v2347_v54 = vpop.f32.mrf.mxu0  ;;  %v4054_v55 = vpop.f32.mrf.mxu1 }
 0x1c3   : > { %v2393_v9 = vadd.f32 %v2347_v54, %v2268_v51 }
 0x1c4   : > { %v2349_v57 = vpop.f32.mrf.mxu0  ;;  %v2510_v58 = vpop.f32.mrf.mxu1 }
 0x1c5   : > { %v2518_v60 = vadd.f32 %v2510_v58, %v2394_v48 }
 0x1c6   : > { %v2350_v45 = vpop.f32.mrf.mxu0  ;;  %v4059_v1 = vpop.f32.mrf.mxu1 }
 0x1c7   : > { %v2527_v53 = vmul.f32 %v2523_v56, %v2518_v60 }
 0x1c8   : > { %v2469_v59 = vpop.f32.mrf.mxu0  ;;  %v2513_v12 = vpop.f32.mrf.mxu1 }
 0x1c9   : > { %v2516_v62 = vadd.f32 %v2469_v59, %v2392_v63  ;;  %v2534_v14 = vadd.f32 %v2530_v2, %v2527_v53 }
 0x1ca   : > { %v2471_v15 = vpop.f32.mrf.mxu0  ;;  %v4060_v22 = vpop.f32.mrf.mxu1 }
 0x1cb   : > { %v2525_v17 = vmul.f32 %v2523_v56, %v2516_v62  ;;  %v2517_v20 = vadd.f32 %v2471_v15, %v2393_v9  ;;  %vm2537_vm15 = vcmp.ge.f32.partialorder %v2534_v14, 0.0  ;;  %v2540_v23 = vmul.f32 0.01, %v2534_v14 }
 0x1cc   : > { %v2473_v25 = vpop.f32.mrf.mxu0 }
 0x1cd   : > { %v2532_v30 = vadd.f32 %v2530_v2, %v2525_v17  ;;  %v2526_v31 = vmul.f32 %v2523_v56, %v2517_v20  ;;  %v2543_v33 = vsel %vm2537_vm15, %v2534_v14, %v2540_v23  ;;  %vm2597_vm15 = vmor %vm2563_vm11, %vm2596_vm14 }
 0x1ce   : > { %v2474_v34 = vpop.f32.mrf.mxu0  ;;  %v2562_v42 = vmul.f32 %v2556_v28, %v2543_v33  ;;  %v4194_v33 = vmov 2  }
 0x1cf   : > { %vm2535_vm12 = vcmp.ge.f32.partialorder %v2532_v30, 0.0  ;;  %v2538_v36 = vmul.f32 0.01, %v2532_v30  ;;  %v2533_v38 = vadd.f32 %v2530_v2, %v2526_v31  ;;  %v3684_v31 = vld [vmem:[%s4833_s5] sm:$0xf]  ;;  %4143 = vset.pattern.permute.xlu0 %v4194_v33  ;;  %v4195_v34 = vmov 3  }
 0x1d0   : > { %v2570_v24 = vpack.c.bf16 %v2562_v42, %v2562_v42  ;;  %4144 = vset.pattern.permute.xlu1 %v4195_v34 }
 0x1d1   : > { %v2541_v8 = vsel %vm2535_vm12, %v2532_v30, %v2538_v36  ;;  %vm2536_vm13 = vcmp.ge.f32.partialorder %v2533_v38, 0.0  ;;  %v2539_v16 = vmul.f32 0.01, %v2533_v38  ;;  %vm2599_vm12 = vmor %vm2598_vm10, %vm2597_vm15 }
 0x1d2   : > { %v2560_v61 = vmul.f32 %v2548_v39, %v2541_v8  ;;  %v2588_v47 = vrot.slane %v2570_v24, %v4255_v7 }
 0x1d3   : > { %v2542_v44 = vsel %vm2536_vm13, %v2533_v38, %v2539_v16 }
 0x1d4   : > { %v2561_v11 = vmul.f32 %v2552_v41, %v2542_v44  ;;  %v3862_v44 = vld [vmem:[%s4832_s4 + $0x2] sm:$0x3] }
 0x1d6   : > { %v3861_v46 = vpack.c.bf16 %v2561_v11, %v2560_v61 }
 0x1d8   : > { %v2581_v4 = vrot.slane %v3861_v46, %v4255_v7 }
 0x1da   : > { %v2589_v49 = vcombine.low %v2581_v4, %v2588_v47 }
 0x1dc   : > { %2590 = vrot.lane.b32.xlu1 %v2589_v49, %s4193_s13  ;;  %s4116_s13 = smul.u32 12, %s4843_s25 }
 0x24e   : > { %v2591_v0 = vpop.permute.xlu1 %2590 }
 0x24f   : > { %v2592_v13 = vrot.slane %v2591_v0, 6 }
 0x251   : > { %v2594_v19 = vsel %vm2593_vm9, %v2592_v13, %v2591_v0  ;;  %v2601_v0 = vld [vmem:[%s4832_s4] sm:$0x3] }
 0x252   : > { %2600 = vst.msk [vmem:[#allocation2] sm:$0x3f] %vm2599_vm12, %v2594_v19 }
 0x259   : > { %v2602_v32 = vld [vmem:[#allocation2] sm:$0x3f] }
 0x25a   : > { %v4645_v50 = vrot.slane %v2602_v32, %v4255_v7  ;;  %v2606_v21 = vcombine.high %v2602_v32, %v2602_v32  ;;  %v2818_v27 = vld [vmem:[#allocation2] sm:$0x3f] }
 0x25b   : > { %v2827_v54 = vrot.slane %v2818_v27, %v4255_v7  ;;  %v2820_v29 = vcombine.high %v2818_v27, %v2818_v27  ;;  %v2942_v35 = vld [vmem:[#allocation2] sm:$0x3f] }
 0x25c   : > { %2622 = vrot.lane.b32.xlu0 %v4645_v50, %s4184_s10  ;;  %v4651_v52 = vcombine.high %v4645_v50, %v4645_v50  ;;  %v4656_v40 = vrot.slane %v2606_v21, %v4255_v7  ;;  %v2951_v57 = vrot.slane %v2942_v35, %v4255_v7  ;;  %v2944_v37 = vcombine.high %v2942_v35, %v2942_v35  ;;  %v3066_v43 = vld [vmem:[#allocation2] sm:$0x3f] }
 0x25d   : > { %v2835_v55 = vcombine.high %v2827_v54, %v2827_v54  ;;  %v2834_v48 = vrot.slane %v2820_v29, %v4255_v7  ;;  %v3075_v60 = vrot.slane %v3066_v43, %v4255_v7  ;;  %v3068_v45 = vcombine.high %v3066_v43, %v3066_v43  ;;  %v3190_v51 = vld [vmem:[#allocation2] sm:$0x3f] }
 0x25e   : > { %2624 = vrot.lane.b32.xlu1 %v4651_v52, %s4184_s10  ;;  %v2959_v58 = vcombine.high %v2951_v57, %v2951_v57  ;;  %v2958_v56 = vrot.slane %v2944_v37, %v4255_v7  ;;  %v3199_v2 = vrot.slane %v3190_v51, %v4255_v7  ;;  %v3192_v53 = vcombine.high %v3190_v51, %v3190_v51  ;;  %v3314_v59 = vld [vmem:[#allocation2] sm:$0x3f] }
 0x25f   : > { %v3083_v63 = vcombine.high %v3075_v60, %v3075_v60  ;;  %v3082_v1 = vrot.slane %v3068_v45, %v4255_v7  ;;  %v3323_v62 = vrot.slane %v3314_v59, %v4255_v7  ;;  %v3316_v10 = vcombine.high %v3314_v59, %v3314_v59  ;;  %v3438_v12 = vld [vmem:[#allocation2] sm:$0x3f] }
 0x260   : > { %2626 = vrot.lane.b32.xlu0 %v4656_v40, %s4184_s10  ;;  %v3207_v6 = vcombine.high %v3199_v2, %v3199_v2  ;;  %v3206_v9 = vrot.slane %v3192_v53, %v4255_v7  ;;  %v3447_v17 = vrot.slane %v3438_v12, %v4255_v7  ;;  %v3440_v18 = vcombine.high %v3438_v12, %v3438_v12  ;;  %v3562_v20 = vld [vmem:[#allocation2] sm:$0x3f]  ;;  %v3877_v53 = vld [vmem:[%s4832_s4 + $0x8] sm:$0x3] }
 0x261   : > { %v3331_v14 = vcombine.high %v3323_v62, %v3323_v62  ;;  %v3330_v15 = vrot.slane %v3316_v10, %v4255_v7  ;;  %v3571_v25 = vrot.slane %v3562_v20, %v4255_v7  ;;  %v3564_v26 = vcombine.high %v3562_v20, %v3562_v20 }
 0x262   : > { %2836 = vrot.lane.b32.xlu1 %v2827_v54, %s4185_s11  ;;  %v3455_v22 = vcombine.high %v3447_v17, %v3447_v17  ;;  %v3454_v23 = vrot.slane %v3440_v18, %v4255_v7  ;;  %v2733_v11 = vsel %vm326_vm1, %v4656_v40, 0  ;;  %v2727_v46 = vsel %vm326_vm1, %v4645_v50, 0  ;;  %v3869_v54 = vld [vmem:[%s4832_s4 + $0x4] sm:$0x3] }
 0x263   : > { %v3579_v28 = vcombine.high %v3571_v25, %v3571_v25  ;;  %v3578_v30 = vrot.slane %v3564_v26, %v4255_v7 }
 0x264   : > { %2838 = vrot.lane.b32.xlu0 %v2835_v55, %s4185_s11 }
 0x266   : > { %2840 = vrot.lane.b32.xlu1 %v2834_v48, %s4185_s11 }
 0x268   : > { %2960 = vrot.lane.b32.xlu0 %v2951_v57, %s4186_s16 }
 0x26a   : > { %2962 = vrot.lane.b32.xlu1 %v2959_v58, %s4186_s16  ;;  %v3873_v58 = vld [vmem:[%s4832_s4 + $0x6] sm:$0x3] }
 0x26c   : > { %2964 = vrot.lane.b32.xlu0 %v2958_v56, %s4186_s16  ;;  %s298_s16 = scalar_lea.vmem %s4835_s7, %s4116_s13 }
 0x26e   : > { %3084 = vrot.lane.b32.xlu1 %v3075_v60, %s4187_s17 }
 0x270   : > { %3086 = vrot.lane.b32.xlu0 %v3083_v63, %s4187_s17 }
 0x272   : > { %3088 = vrot.lane.b32.xlu1 %v3082_v1, %s4187_s17 }
 0x274   : > { %3208 = vrot.lane.b32.xlu0 %v3199_v2, %s4188_s18 }
 0x276   : > { %3210 = vrot.lane.b32.xlu1 %v3207_v6, %s4188_s18 }
 0x278   : > { %3212 = vrot.lane.b32.xlu0 %v3206_v9, %s4188_s18 }
 0x27a   : > { %3332 = vrot.lane.b32.xlu1 %v3323_v62, %s4189_s19 }
 0x27c   : > { %3334 = vrot.lane.b32.xlu0 %v3331_v14, %s4189_s19  ;;  %v3881_v14 = vld [vmem:[%s4832_s4 + $0xa] sm:$0x3] }
 0x27e   : > { %3336 = vrot.lane.b32.xlu1 %v3330_v15, %s4189_s19 }
 0x280   : > { %3456 = vrot.lane.b32.xlu0 %v3447_v17, %s4190_s20 }
 0x282   : > { %3458 = vrot.lane.b32.xlu1 %v3455_v22, %s4190_s20 }
 0x284   : > { %3460 = vrot.lane.b32.xlu0 %v3454_v23, %s4190_s20 }
 0x286   : > { %3580 = vrot.lane.b32.xlu1 %v3571_v25, %s4191_s21  ;;  %v3885_v25 = vld [vmem:[%s4832_s4 + $0xc] sm:$0x3] }
 0x288   : > { %3582 = vrot.lane.b32.xlu0 %v3579_v28, %s4191_s21 }
 0x28a   : > { %3584 = vrot.lane.b32.xlu1 %v3578_v30, %s4191_s21 }
 0x28c   : > { %3687 = vperm.xlu0 %4143, %v3684_v31  }
 0x28e   : > { %3694 = vperm.xlu1 %4144, %v3684_v31  }
 0x290   : > { %4145 = vset.pattern.permute.xlu0 %v4195_v34 }
 0x2ce   : > { %v2623_v36 = vpop.permute.xlu0 %2622 }
 0x2d0   : > { %v2625_v38 = vpop.permute.xlu1 %2624 }
 0x2d1   : > { %v2628_v39 = vsel %vm553_vm3, %v2623_v36, %v2625_v38  ;;  %v3889_v36 = vld [vmem:[%s4832_s4 + $0xe] sm:$0x3] }
 0x2d2   : > { %v2627_v41 = vpop.permute.xlu0 %2626  ;;  %v2634_v8 = vsel %vm326_vm1, %v2628_v39, 0 }
 0x2d3   : > { %v2629_v7 = vsel %vm553_vm3, %v2625_v38, %v2627_v41  ;;  %v2640_v42 = vsel %vm326_vm1, %v2627_v41, 0  ;;  %vm4838_vm3 = vcmask 744448  }
 0x2d4   : > { %v2837_v16 = vpop.permute.xlu1 %2836  ;;  %3863 = vmatprep.subr.msk.bf16.mxu0 %vm326_vm1, %v2629_v7  ;;  %4062 = vmatpush3.bf16.msra.mxu1 %v2640_v42  ;;  %v3893_v7 = vld [vmem:[%s4832_s4 + $0x10] sm:$0x3] }
 0x2d5   : > { %2657 = vmatpush1.bf16.msra.mxu0 %v2634_v8  ;;  %4067 = vmatprep.subr.bf16.mxu1 %v4182_v5 }
 0x2d6   : > { %3866 = vmatprep.subr.msk.bf16.mxu0 %vm326_vm1, %v4651_v52  ;;  %v2839_v61 = vpop.permute.xlu0 %2838 }
 0x2d7   : > { %4064 = vmatmul.mubr.msk.bf16.vlgmr.msra.gmra.mxu1 %vm322_vm2, %v3862_v44  ;;  %v2842_v13 = vsel %vm802_vm4, %v2837_v16, %v2839_v61 }
 0x2d8   : > { %v2841_v24 = vpop.permute.xlu1 %2840  ;;  %3864 = vmatmul.mubr.msk.bf16.vlgmr.msra.gmra.mxu0 %vm322_vm2, %v3862_v44  ;;  %4068 = vmatpush3.bf16.msra.mxu1 %v2733_v11  ;;  %v2848_v21 = vsel %vm326_vm1, %v2842_v13, 0 }
 0x2d9   : > { %v2843_v4 = vsel %vm802_vm4, %v2839_v61, %v2841_v24  ;;  %2750 = vmatpush1.bf16.msra.mxu0 %v2727_v46  ;;  %4069 = vmatprep.mubr.msk.bf16.mxu1 %vm4183_vm0, %v4182_v5  ;;  %v2854_v32 = vsel %vm326_vm1, %v2841_v24, 0  ;;  %vm4839_vm4 = vmmov %vm4838_vm3 }
 0x2da   : > { %3870 = vmatprep.subr.msk.bf16.mxu0 %vm326_vm1, %v2843_v4  ;;  %v2961_v47 = vpop.permute.xlu0 %2960  ;;  %4073 = vmatprep.subr.bf16.mxu1 %v4182_v5 }
 0x2db   : > { %2767 = vmatprep.mubr.bf16.mxu0 %v4181_v3 }
 0x2dc   : > { %v2963_v49 = vpop.permute.xlu1 %2962 }
 0x2dd   : > { %v2966_v29 = vsel %vm1051_vm5, %v2961_v47, %v2963_v49 }
 0x2de   : > { %v2965_v19 = vpop.permute.xlu0 %2964  ;;  %v2972_v48 = vsel %vm326_vm1, %v2966_v29, 0 }
 0x2df   : > { %v2967_v50 = vsel %vm1051_vm5, %v2963_v49, %v2965_v19  ;;  %4070 = vmatmul.mubr.msk.bf16.vlgmr.msra.gmra.mxu1 %vm322_vm2, %v2601_v0  ;;  %v2978_v55 = vsel %vm326_vm1, %v2965_v19, 0  ;;  %vm4840_vm5 = vcmask 736256  }
 0x2e0   : > { %4074 = vmatpush3.bf16.msra.mxu1 %v2854_v32  ;;  %v3085_v27 = vpop.permute.xlu1 %3084  ;;  %3867 = vmatmul.mubr.msk.bf16.vlgmr.msra.gmra.mxu0 %vm322_vm2, %v2601_v0 }
 0x2e1   : > { %2871 = vmatpush1.bf16.msra.mxu0 %v2848_v21  ;;  %4075 = vmatprep.mubr.msk.bf16.mxu1 %vm4183_vm0, %v4182_v5 }
 0x2e2   : > { %3874 = vmatprep.subr.msk.bf16.mxu0 %vm326_vm1, %v2967_v50  ;;  %v3087_v52 = vpop.permute.xlu0 %3086  ;;  %4079 = vmatprep.subr.bf16.mxu1 %v4182_v5 }
 0x2e3   : > { %2888 = vmatprep.mubr.bf16.mxu0 %v4181_v3  ;;  %v3090_v56 = vsel %vm1300_vm6, %v3085_v27, %v3087_v52 }
 0x2e4   : > { %v3089_v40 = vpop.permute.xlu1 %3088  ;;  %v3096_v51 = vsel %vm326_vm1, %v3090_v56, 0 }
 0x2e5   : > { %v3091_v37 = vsel %vm1300_vm6, %v3087_v52, %v3089_v40  ;;  %v3102_v45 = vsel %vm326_vm1, %v3089_v40, 0  ;;  %vm4841_vm6 = vmmov %vm4840_vm5 }
 0x2e6   : > { %v3209_v35 = vpop.permute.xlu0 %3208 }
 0x2e7   : > { %4076 = vmatmul.mubr.msk.bf16.vlgmr.msra.gmra.mxu1 %vm322_vm2, %v3869_v54 }
 0x2e8   : > { %4080 = vmatpush3.bf16.msra.mxu1 %v2978_v55  ;;  %v3211_v57 = vpop.permute.xlu1 %3210  ;;  %3871 = vmatmul.mubr.msk.bf16.vlgmr.msra.gmra.mxu0 %vm322_vm2, %v3869_v54 }
 0x2e9   : > { %2995 = vmatpush1.bf16.msra.mxu0 %v2972_v48  ;;  %4081 = vmatprep.mubr.msk.bf16.mxu1 %vm4183_vm0, %v4182_v5  ;;  %v3214_v59 = vsel %vm1549_vm7, %v3209_v35, %v3211_v57 }
 0x2ea   : > { %3878 = vmatprep.subr.msk.bf16.mxu0 %vm326_vm1, %v3091_v37  ;;  %4085 = vmatprep.subr.bf16.mxu1 %v4182_v5  ;;  %v3213_v43 = vpop.permute.xlu0 %3212  ;;  %v3220_v9 = vsel %vm326_vm1, %v3214_v59, 0 }
 0x2eb   : > { %3012 = vmatprep.mubr.bf16.mxu0 %v4181_v3  ;;  %v3215_v63 = vsel %vm1549_vm7, %v3211_v57, %v3213_v43  ;;  %v3226_v6 = vsel %vm326_vm1, %v3213_v43, 0 }
 0x2ec   : > { %v3333_v60 = vpop.permute.xlu1 %3332 }
 0x2ee   : > { %v3335_v1 = vpop.permute.xlu0 %3334 }
 0x2ef   : > { %4082 = vmatmul.mubr.msk.bf16.vlgmr.msra.gmra.mxu1 %vm322_vm2, %v3873_v58  ;;  %v3338_v15 = vsel %vm1798_vm8, %v3333_v60, %v3335_v1 }
 0x2f0   : > { %4086 = vmatpush3.bf16.msra.mxu1 %v3102_v45  ;;  %3875 = vmatmul.mubr.msk.bf16.vlgmr.msra.gmra.mxu0 %vm322_vm2, %v3873_v58  ;;  %v3337_v2 = vpop.permute.xlu1 %3336  ;;  %v3344_v20 = vsel %vm326_vm1, %v3338_v15, 0 }
 0x2f1   : > { %3119 = vmatpush1.bf16.msra.mxu0 %v3096_v51  ;;  %4087 = vmatprep.mubr.msk.bf16.mxu1 %vm4183_vm0, %v4182_v5  ;;  %v3339_v10 = vsel %vm1798_vm8, %v3335_v1, %v3337_v2  ;;  %v3350_v18 = vsel %vm326_vm1, %v3337_v2, 0 }
 0x2f2   : > { %3882 = vmatprep.subr.msk.bf16.mxu0 %vm326_vm1, %v3215_v63  ;;  %4091 = vmatprep.subr.bf16.mxu1 %v4182_v5  ;;  %v3457_v62 = vpop.permute.xlu0 %3456 }
 0x2f3   : > { %3136 = vmatprep.mubr.bf16.mxu0 %v4181_v3 }
 0x2f4   : > { %v3459_v12 = vpop.permute.xlu1 %3458 }
 0x2f5   : > { %v3462_v26 = vsel %vm4839_vm4, %v3457_v62, %v3459_v12 }
 0x2f6   : > { %v3461_v17 = vpop.permute.xlu0 %3460  ;;  %v3468_v31 = vsel %vm326_vm1, %v3462_v26, 0 }
 0x2f7   : > { %4088 = vmatmul.mubr.msk.bf16.vlgmr.msra.gmra.mxu1 %vm322_vm2, %v3877_v53  ;;  %v3463_v23 = vsel %vm4838_vm3, %v3459_v12, %v3461_v17  ;;  %v3474_v30 = vsel %vm326_vm1, %v3461_v17, 0 }
 0x2f8   : > { %4092 = vmatpush3.bf16.msra.mxu1 %v3226_v6  ;;  %3879 = vmatmul.mubr.msk.bf16.vlgmr.msra.gmra.mxu0 %vm322_vm2, %v3877_v53  ;;  %v3581_v22 = vpop.permute.xlu1 %3580 }
 0x2f9   : > { %3243 = vmatpush1.bf16.msra.mxu0 %v3220_v9  ;;  %4093 = vmatprep.mubr.msk.bf16.mxu1 %vm4183_vm0, %v4182_v5 }
 0x2fa   : > { %3886 = vmatprep.subr.msk.bf16.mxu0 %vm326_vm1, %v3339_v10  ;;  %4097 = vmatprep.subr.bf16.mxu1 %v4182_v5  ;;  %v3583_v33 = vpop.permute.xlu0 %3582 }
 0x2fb   : > { %3260 = vmatprep.mubr.bf16.mxu0 %v4181_v3  ;;  %v3586_v38 = vsel %vm4841_vm6, %v3581_v22, %v3583_v33 }
 0x2fc   : > { %v3585_v28 = vpop.permute.xlu1 %3584  ;;  %v3592_v41 = vsel %vm326_vm1, %v3586_v38, 0 }
 0x2fd   : > { %v3587_v34 = vsel %vm4840_vm5, %v3583_v33, %v3585_v28  ;;  %v3598_v39 = vsel %vm326_vm1, %v3585_v28, 0 }
 0x2ff   : > { %4094 = vmatmul.mubr.msk.bf16.vlgmr.msra.gmra.mxu1 %vm322_vm2, %v3881_v14 }
 0x300   : > { %4098 = vmatpush3.bf16.msra.mxu1 %v3350_v18  ;;  %3883 = vmatmul.mubr.msk.bf16.vlgmr.msra.gmra.mxu0 %vm322_vm2, %v3881_v14 }
 0x301   : > { %3367 = vmatpush1.bf16.msra.mxu0 %v3344_v20  ;;  %4099 = vmatprep.mubr.msk.bf16.mxu1 %vm4183_vm0, %v4182_v5 }
 0x302   : > { %3890 = vmatprep.subr.msk.bf16.mxu0 %vm326_vm1, %v3463_v23  ;;  %4103 = vmatprep.subr.bf16.mxu1 %v4182_v5 }
 0x303   : > { %3384 = vmatprep.mubr.bf16.mxu0 %v4181_v3 }
 0x307   : > { %4100 = vmatmul.mubr.msk.bf16.vlgmr.msra.gmra.mxu1 %vm322_vm2, %v3885_v25 }
 0x308   : > { %4104 = vmatpush3.bf16.msra.mxu1 %v3474_v30  ;;  %3887 = vmatmul.mubr.msk.bf16.vlgmr.msra.gmra.mxu0 %vm322_vm2, %v3885_v25 }
 0x309   : > { %3491 = vmatpush1.bf16.msra.mxu0 %v3468_v31  ;;  %4105 = vmatprep.mubr.msk.bf16.mxu1 %vm4183_vm0, %v4182_v5 }
 0x30a   : > { %3894 = vmatprep.subr.msk.bf16.mxu0 %vm326_vm1, %v3587_v34  ;;  %4109 = vmatprep.subr.bf16.mxu1 %v4182_v5 }
 0x30b   : > { %3508 = vmatprep.mubr.bf16.mxu0 %v4181_v3 }
 0x30f   : > { %4106 = vmatmul.mubr.msk.bf16.vlgmr.msra.gmra.mxu1 %vm322_vm2, %v3889_v36 }
 0x310   : > { %4110 = vmatpush3.bf16.msra.mxu1 %v3598_v39  ;;  %3891 = vmatmul.mubr.msk.bf16.vlgmr.msra.gmra.mxu0 %vm322_vm2, %v3889_v36 }
 0x311   : > { %3615 = vmatpush1.bf16.msra.mxu0 %v3592_v41  ;;  %4111 = vmatprep.mubr.msk.bf16.mxu1 %vm4183_vm0, %v4182_v5  ;;  %vm3714_vm0 = vcmask 551936  }
 0x312   : > { %3632 = vmatprep.mubr.bf16.mxu0 %v4181_v3 }
 0x317   : > { %4112 = vmatmul.mubr.msk.bf16.vlgmr.msra.gmra.mxu1 %vm322_vm2, %v3893_v7 }
 0x318   : > { %3895 = vmatmul.mubr.msk.bf16.vlgmr.msra.gmra.mxu0 %vm322_vm2, %v3893_v7 }
 0x397   : > { %v2717_v42 = vpop.f32.mrf.mxu1 }
 0x398   : > { %v2676_v8 = vpop.f32.mrf.mxu0 }
 0x399   : > { %v4065_v16 = vpop.f32.mrf.mxu1 }
 0x39a   : > { %v2678_v44 = vpop.f32.mrf.mxu0 }
 0x39b   : > { %v2720_v61 = vpop.f32.mrf.mxu1 }
 0x39c   : > { %v2680_v11 = vpop.f32.mrf.mxu0 }
 0x39d   : > { %v4066_v24 = vpop.f32.mrf.mxu1 }
 0x39e   : > { %v2681_v46 = vpop.f32.mrf.mxu0 }
 0x39f   : > { %v2810_v4 = vpop.f32.mrf.mxu1 }
 0x3a0   : > { %v2769_v5 = vpop.f32.mrf.mxu0  ;;  %v2811_v23 = vadd.f32 %v2810_v4, %v2717_v42 }
 0x3a1   : > { %v4071_v47 = vpop.f32.mrf.mxu1  ;;  %v2770_v26 = vadd.f32 %v2769_v5, %v2676_v8 }
 0x3a2   : > { %v2771_v3 = vpop.f32.mrf.mxu0 }
 0x3a3   : > { %v2813_v49 = vpop.f32.mrf.mxu1  ;;  %v2772_v33 = vadd.f32 %v2771_v3, %v2678_v44 }
 0x3a4   : > { %v2773_v0 = vpop.f32.mrf.mxu0 }
 0x3a5   : > { %v4072_v13 = vpop.f32.mrf.mxu1 }
 0x3a6   : > { %v2774_v19 = vpop.f32.mrf.mxu0 }
 0x3a7   : > { %v2931_v32 = vpop.f32.mrf.mxu1 }
 0x3a8   : > { %v2890_v50 = vpop.f32.mrf.mxu0  ;;  %v2939_v30 = vadd.f32 %v2931_v32, %v2811_v23 }
 0x3a9   : > { %v4077_v21 = vpop.f32.mrf.mxu1  ;;  %v2937_v34 = vadd.f32 %v2890_v50, %v2770_v26 }
 0x3aa   : > { %v2892_v27 = vpop.f32.mrf.mxu0 }
 0x3ab   : > { %v2934_v52 = vpop.f32.mrf.mxu1  ;;  %v2938_v41 = vadd.f32 %v2892_v27, %v2772_v33 }
 0x3ac   : > { %v2894_v40 = vpop.f32.mrf.mxu0 }
 0x3ad   : > { %v4078_v54 = vpop.f32.mrf.mxu1  ;;  %v3688_v40 = vpop.permute.xlu0 %3687 }
 0x3ae   : > { %v2895_v29 = vpop.f32.mrf.mxu0 }
 0x3af   : > { %v3055_v35 = vpop.f32.mrf.mxu1 }
 0x3b0   : > { %v3014_v55 = vpop.f32.mrf.mxu0  ;;  %v3063_v38 = vadd.f32 %v3055_v35, %v2939_v30 }
 0x3b1   : > { %v4083_v48 = vpop.f32.mrf.mxu1  ;;  %v3061_v7 = vadd.f32 %v3014_v55, %v2937_v34 }
 0x3b2   : > { %v3016_v57 = vpop.f32.mrf.mxu0  ;;  %v3695_v48 = vpop.permute.xlu1 %3694 }
 0x3b3   : > { %v3058_v37 = vpop.f32.mrf.mxu1  ;;  %v3062_v24 = vadd.f32 %v3016_v57, %v2938_v41 }
 0x3b4   : > { %v3018_v43 = vpop.f32.mrf.mxu0 }
 0x3b5   : > { %v4084_v58 = vpop.f32.mrf.mxu1 }
 0x3b6   : > { %v3019_v56 = vpop.f32.mrf.mxu0 }
 0x3b7   : > { %v3179_v60 = vpop.f32.mrf.mxu1 }
 0x3b8   : > { %v3138_v45 = vpop.f32.mrf.mxu0  ;;  %v3187_v61 = vadd.f32 %v3179_v60, %v3063_v38 }
 0x3b9   : > { %v4089_v51 = vpop.f32.mrf.mxu1  ;;  %v3185_v46 = vadd.f32 %v3138_v45, %v3061_v7 }
 0x3ba   : > { %v3140_v63 = vpop.f32.mrf.mxu0 }
 0x3bb   : > { %v3182_v1 = vpop.f32.mrf.mxu1  ;;  %v3186_v4 = vadd.f32 %v3140_v63, %v3062_v24 }
 0x3bc   : > { %v3142_v2 = vpop.f32.mrf.mxu0 }
 0x3bd   : > { %v4090_v53 = vpop.f32.mrf.mxu1 }
 0x3be   : > { %v3143_v59 = vpop.f32.mrf.mxu0 }
 0x3bf   : > { %v3303_v6 = vpop.f32.mrf.mxu1 }
 0x3c0   : > { %v3262_v9 = vpop.f32.mrf.mxu0  ;;  %v3311_v49 = vadd.f32 %v3303_v6, %v3187_v61 }
 0x3c1   : > { %v4095_v62 = vpop.f32.mrf.mxu1  ;;  %v3309_v8 = vadd.f32 %v3262_v9, %v3185_v46 }
 0x3c2   : > { %v3264_v10 = vpop.f32.mrf.mxu0 }
 0x3c3   : > { %v3306_v12 = vpop.f32.mrf.mxu1  ;;  %v3310_v44 = vadd.f32 %v3264_v10, %v3186_v4 }
 0x3c4   : > { %v3266_v14 = vpop.f32.mrf.mxu0 }
 0x3c5   : > { %v4096_v15 = vpop.f32.mrf.mxu1 }
 0x3c6   : > { %v3267_v17 = vpop.f32.mrf.mxu0 }
 0x3c7   : > { %v3427_v18 = vpop.f32.mrf.mxu1 }
 0x3c8   : > { %v3386_v20 = vpop.f32.mrf.mxu0  ;;  %v3435_v0 = vadd.f32 %v3427_v18, %v3311_v49 }
 0x3c9   : > { %v4101_v22 = vpop.f32.mrf.mxu1  ;;  %v3433_v3 = vadd.f32 %v3386_v20, %v3309_v8 }
 0x3ca   : > { %v3388_v25 = vpop.f32.mrf.mxu0 }
 0x3cb   : > { %v3430_v28 = vpop.f32.mrf.mxu1  ;;  %v3434_v21 = vadd.f32 %v3388_v25, %v3310_v44 }
 0x3cc   : > { %v3390_v31 = vpop.f32.mrf.mxu0 }
 0x3cd   : > { %v4102_v36 = vpop.f32.mrf.mxu1 }
 0x3ce   : > { %v3391_v39 = vpop.f32.mrf.mxu0 }
 0x3cf   : > { %v3551_v16 = vpop.f32.mrf.mxu1 }
 0x3d0   : > { %v3510_v11 = vpop.f32.mrf.mxu0  ;;  %v3559_v32 = vadd.f32 %v3551_v16, %v3435_v0 }
 0x3d1   : > { %v4107_v47 = vpop.f32.mrf.mxu1  ;;  %v3557_v27 = vadd.f32 %v3510_v11, %v3433_v3 }
 0x3d2   : > { %v3512_v42 = vpop.f32.mrf.mxu0 }
 0x3d3   : > { %v3554_v5 = vpop.f32.mrf.mxu1  ;;  %v3558_v35 = vadd.f32 %v3512_v42, %v3434_v21 }
 0x3d4   : > { %v3514_v13 = vpop.f32.mrf.mxu0 }
 0x3d5   : > { %v4108_v19 = vpop.f32.mrf.mxu1 }
 0x3d6   : > { %v3515_v50 = vpop.f32.mrf.mxu0 }
 0x3d7   : > { %v3675_v52 = vpop.f32.mrf.mxu1 }
 0x3d8   : > { %v3683_v54 = vadd.f32 %v3675_v52, %v3559_v32  ;;  %v3634_v29 = vpop.f32.mrf.mxu0 }
 0x3d9   : > { %v3681_v55 = vadd.f32 %v3634_v29, %v3557_v27  ;;  %v4113_v57 = vpop.f32.mrf.mxu1 }
 0x3da   : > { %v3692_v37 = vmul.f32 %v3688_v40, %v3683_v54  ;;  %v3636_v43 = vpop.f32.mrf.mxu0 }
 0x3db   : > { %v3690_v58 = vmul.f32 %v3688_v40, %v3681_v55  ;;  %v3682_v56 = vadd.f32 %v3636_v43, %v3558_v35  ;;  %v3678_v60 = vpop.f32.mrf.mxu1 }
 0x3dc   : > { %v3699_v45 = vadd.f32 %v3695_v48, %v3692_v37  ;;  %v3638_v51 = vpop.f32.mrf.mxu0 }
 0x3dd   : > { %v3691_v63 = vmul.f32 %v3688_v40, %v3682_v56  ;;  %v3697_v1 = vadd.f32 %v3695_v48, %v3690_v58  ;;  %v4114_v2 = vpop.f32.mrf.mxu1 }
 0x3de   : > { %vm3702_vm1 = vcmp.ge.f32.partialorder %v3699_v45, 0.0  ;;  %v3705_v53 = vmul.f32 0.01, %v3699_v45  ;;  %v3639_v59 = vpop.f32.mrf.mxu0 }
 0x3df   : > { %v3698_v6 = vadd.f32 %v3695_v48, %v3691_v63  ;;  %v3703_v9 = vmul.f32 0.01, %v3697_v1  ;;  %vm3700_vm2 = vcmp.ge.f32.partialorder %v3697_v1, 0.0 }
 0x3e0   : > { %v3708_v62 = vsel %vm3702_vm1, %v3699_v45, %v3705_v53 }
 0x3e1   : > { %vm3701_vm7 = vcmp.ge.f32.partialorder %v3698_v6, 0.0  ;;  %v3704_v10 = vmul.f32 0.01, %v3698_v6  ;;  %3715 = vst.msk [vmem:[%s298_s16 + $0x8] sm:$0xf] %vm3714_vm0, %v3708_v62  ;;  %v3706_v12 = vsel %vm3700_vm2, %v3697_v1, %v3703_v9 }
 0x3e3   : > { %v3707_v14 = vsel %vm3701_vm7, %v3698_v6, %v3704_v10 }
 0x3e4   : > { %v3711_v15 = vcombine.low %v3706_v12, %v3707_v14 }
 0x3e6   : > { %3713 = vst [vmem:[%s298_s16] sm:$0xff] %v3711_v15 }
 0x3e7 PF: > { %s17_s24 = sadd.s32 1, %s4178_s24  }
 0x3e8   : > { %p14_p4 = scmp.ge.s32.totalorder %s17_s24, 4  }
 0x3ea   :  { %16 = sbr.rel (!%p14_p4) target bundleno = 1 (0x1), region = 105 }

</bundles_post_ra>
